<compile_context>
chip_gen: v6e
topology: v6e:2x2x1
jax: 0.10.0
libtpu: 0.0.40
codegen_flags: <defaults>
</compile_context>

<pallas_src>
import jax
import jax.numpy as jnp
from jax.experimental import pallas as pl
from jax.experimental.pallas import tpu as pltpu

MULTIRES = 6
IN_DIM = 3
POS_DIM = IN_DIM + IN_DIM * 2 * MULTIRES   # 39
PE_ROWS = POS_DIM + 1                      # 40: extra "ones" row carries b1
RUN_DIM = 256
TM_MAX = 4096                              # points per grid step (multiple of 128/256)
VMEM_LIMIT_BYTES = 32 * 1024 * 1024        # safe on v5e/v6e/v7x; raises v5e's 16MiB default


def _ior_kernel(x_ref, w1_ref, w2_ref, b2_ref, w34_ref, b34_ref, o_ref):
    x = x_ref[...]                                   # (3, TM) f32, points along lanes
    tm = x.shape[1]

    # Positional encoding: one sin + one cos on an (18, TM) slab; a ones row carries
    # the layer-1 bias through the (free, sublane-padded) 40th PE row.
    xf = jnp.concatenate([x * (2.0 ** k) for k in range(MULTIRES)], axis=0)      # (18, TM)
    ones = jnp.ones((1, tm), jnp.float32)
    pe = jnp.concatenate([x, jnp.sin(xf), jnp.cos(xf), ones], axis=0)            # (40, TM)
    pe = pe.astype(jnp.bfloat16)

    # Layer 1: MXU (bf16 in, f32 acc); bias already folded into the matmul, so the
    # epilogue is a single fused cast + ReLU in bf16.
    h = jnp.dot(w1_ref[...], pe, preferred_element_type=jnp.float32)             # (256, TM)
    h = jnp.maximum(h.astype(jnp.bfloat16), 0.0)

    # Layer 2: bf16 bias + ReLU epilogue (half the vregs / load-store traffic of f32).
    h = jnp.dot(w2_ref[...], h, preferred_element_type=jnp.float32)              # (256, TM)
    h = jnp.maximum(h.astype(jnp.bfloat16) + b2_ref[...], 0.0)

    # Layers 3+4 fused in the wrapper (no nonlinearity in between) + sigmoid, f32.
    y = jnp.dot(w34_ref[...], h, preferred_element_type=jnp.float32) + b34_ref[...]
    o_ref[...] = jax.nn.sigmoid(y)                   # (1, TM), lane-dense


def _round_up(v, m):
    return ((v + m - 1) // m) * m


def _choose_tm(n):
    """Points per grid step: lane-aligned (multiple of 128), as large as TM_MAX to
    amortize the ~0.35us per-step overhead, but keep >= 2 steps when the point count
    allows so both v7x TensorCores get work via the "parallel" grid axis."""
    n = max(int(n), 1)
    if n <= 128:
        return 128
    return min(TM_MAX, _round_up(-(-n // 2), 128))


def _pe_permutation():
    """Map kernel PE layout [x | sin-block | cos-block] (freq-major, xyz-minor)
    onto the PyTorch Embedder's interleaved [x, sin(f0 x), cos(f0 x), sin(f1 x), ...]."""
    perm = list(range(IN_DIM))
    for m in range(MULTIRES):
        for d in range(IN_DIM):
            perm.append(IN_DIM + 2 * IN_DIM * m + d)           # sin(f_m * x_d)
    for m in range(MULTIRES):
        for d in range(IN_DIM):
            perm.append(IN_DIM + 2 * IN_DIM * m + IN_DIM + d)  # cos(f_m * x_d)
    return tuple(perm)


_PERM = _pe_permutation()


def _full_spec(shape):
    return pl.BlockSpec(shape, lambda i: tuple(0 for _ in shape))


def prepare_params(params):
    """One-time weight preparation (hoisted out of the hot path): PE column permutation,
    b1 folded into a bias column of w1, layer-3/4 fusion, bf16 casts, bias reshapes.
    `params` holds the *effective* weight-norm weights (out,in) and biases (out,)."""
    perm = jnp.asarray(_PERM, dtype=jnp.int32)
    w1 = jnp.concatenate(
        [params["w1"][:, perm], params["b1"].reshape(RUN_DIM, 1)], axis=1
    ).astype(jnp.bfloat16)                                        # (256, 40)
    w2 = params["w2"].astype(jnp.bfloat16)                        # (256, 256)
    b2 = params["b2"].reshape(RUN_DIM, 1).astype(jnp.bfloat16)    # (256, 1)
    # Fuse layers 3 & 4 (no nonlinearity in between): y = w4 @ (w3 h + b3) + b4.
    w34 = (params["w4"] @ params["w3"]).astype(jnp.bfloat16)      # (1, 256)
    b34 = (params["w4"] @ params["b3"] + params["b4"]).reshape(1, 1)  # (1, 1) f32
    return dict(w1=w1, w2=w2, b2=b2, w34=w34, b34=b34)


@jax.jit
def ior_network_pallas(x, prepared):
    """x: (N, 3) float32; prepared: output of prepare_params()."""
    n = x.shape[0]
    tm = _choose_tm(n)
    n_pad = _round_up(n, tm)

    # Transposed, lane-dense point layout: (3, N_pad).
    # TODO(synk): callers that can supply x already as (3, N) avoid this HBM pass.
    x_t = jnp.pad(x, ((0, n_pad - n), (0, 0))).T

    out = pl.pallas_call(
        _ior_kernel,
        out_shape=jax.ShapeDtypeStruct((1, n_pad), jnp.float32),
        grid_spec=pltpu.PrefetchScalarGridSpec(
            num_scalar_prefetch=0,
            grid=(n_pad // tm,),
            in_specs=[
                pl.BlockSpec((IN_DIM, tm), lambda i: (0, i)),
                _full_spec((RUN_DIM, PE_ROWS)),
                _full_spec((RUN_DIM, RUN_DIM)),
                _full_spec((RUN_DIM, 1)),
                _full_spec((1, RUN_DIM)),
                _full_spec((1, 1)),
            ],
            out_specs=pl.BlockSpec((1, tm), lambda i: (0, i)),
        ),
        compiler_params=pltpu.CompilerParams(
            dimension_semantics=("parallel",),
            vmem_limit_bytes=VMEM_LIMIT_BYTES,
        ),
    )(x_t, prepared["w1"], prepared["w2"], prepared["b2"],
      prepared["w34"], prepared["b34"])
    return out[0, :n][:, None]


def _init_weight_norm_linear(key, fan_in, fan_out):
    """nn.Linear init + weight_norm(dim=0): w_eff = g * v / ||v||_row, g=||v|| at init."""
    kv, kb = jax.random.split(key)
    bound = 1.0 / float(fan_in) ** 0.5
    v = jax.random.uniform(kv, (fan_out, fan_in), jnp.float32, -bound, bound)
    norm = jnp.linalg.norm(v, axis=1, keepdims=True)
    w_eff = norm * v / norm  # == v at init; kept in weight_norm form
    b = jax.random.uniform(kb, (fan_out,), jnp.float32, -bound, bound)
    return w_eff, b


def make_params(seed=0):
    key = jax.random.PRNGKey(seed)
    k1, k2, k3, k4 = jax.random.split(key, 4)
    w1, b1 = _init_weight_norm_linear(k1, POS_DIM, RUN_DIM)
    w2, b2 = _init_weight_norm_linear(k2, RUN_DIM, RUN_DIM)
    w3, b3 = _init_weight_norm_linear(k3, RUN_DIM, RUN_DIM)
    w4, b4 = _init_weight_norm_linear(k4, RUN_DIM, 1)
    return dict(w1=w1, b1=b1, w2=w2, b2=b2, w3=w3, b3=b3, w4=w4, b4=b4)


def _reference(x, p):
    """Pure-JAX f32 replica of the PyTorch forward (interleaved PE, unfused layers)."""
    feats = [x]
    for k in range(MULTIRES):
        f = 2.0 ** k
        feats.append(jnp.sin(x * f))
        feats.append(jnp.cos(x * f))
    pe = jnp.concatenate(feats, axis=-1)
    h = jnp.maximum(pe @ p["w1"].T + p["b1"], 0.0)
    h = jnp.maximum(h @ p["w2"].T + p["b2"], 0.0)
    h = h @ p["w3"].T + p["b3"]
    h = h @ p["w4"].T + p["b4"]
    return jax.nn.sigmoid(h)


if __name__ == "__main__":
    params = make_params(seed=0)
    prepared = prepare_params(params)   # one-time weight prep, outside the hot path

    # Small test (single grid step).
    x_small = jax.random.normal(jax.random.PRNGKey(0), (16, 3), jnp.float32)
    out_small = jax.block_until_ready(ior_network_pallas(x_small, prepared))
    ref_small = _reference(x_small, params)
    assert out_small.shape == (16, 1)
    assert jnp.all(jnp.isfinite(out_small))
    assert jnp.allclose(out_small, ref_small, atol=1e-2, rtol=1e-2)

    # Larger test exercising the multi-step pipelined grid + padding path.
    x_big = jax.random.normal(jax.random.PRNGKey(1), (300, 3), jnp.float32)
    out_big = jax.block_until_ready(ior_network_pallas(x_big, prepared))
    ref_big = _reference(x_big, params)
    assert out_big.shape == (300, 1)
    assert jnp.all(jnp.isfinite(out_big))
    assert jnp.allclose(out_big, ref_big, atol=1e-2, rtol=1e-2)

    print("KERNEL_OK")
</pallas_src>

<mosaic_0001>
module attributes {stable_mosaic.version = 11 : i64} {
  func.func @_ior_kernel(%arg0: i32, %arg1: memref<3x128xf32, #tpu.memory_space<vmem>>, %arg2: memref<256x40xbf16, #tpu.memory_space<vmem>>, %arg3: memref<256x256xbf16, #tpu.memory_space<vmem>>, %arg4: memref<256x1xbf16, #tpu.memory_space<vmem>>, %arg5: memref<1x256xbf16, #tpu.memory_space<vmem>>, %arg6: memref<1x1xf32, #tpu.memory_space<vmem>>, %arg7: memref<1x128xf32, #tpu.memory_space<vmem>>) attributes {dimension_semantics = [#tpu.dimension_semantics<parallel>], iteration_bounds = array<i64: 1>, scalar_prefetch = 0 : i64, scratch_operands = 0 : i64, tpu.core_type = #tpu.core_type<tc>, window_params = [{transform_indices = @transform_0, window_bounds = array<i64: 3, 128>}, {pipeline_mode = #tpu.pipeline_mode<synchronous>, transform_indices = @transform_1, window_bounds = array<i64: 256, 40>}, {pipeline_mode = #tpu.pipeline_mode<synchronous>, transform_indices = @transform_2, window_bounds = array<i64: 256, 256>}, {pipeline_mode = #tpu.pipeline_mode<synchronous>, transform_indices = @transform_3, window_bounds = array<i64: 256, 1>}, {pipeline_mode = #tpu.pipeline_mode<synchronous>, transform_indices = @transform_4, window_bounds = array<i64: 1, 256>}, {pipeline_mode = #tpu.pipeline_mode<synchronous>, transform_indices = @transform_5, window_bounds = array<i64: 1, 1>}, {transform_indices = @transform_6, window_bounds = array<i64: 1, 128>}]} {
    %c0 = arith.constant 0 : index
    %c0_0 = arith.constant 0 : index
    %0 = vector.load %arg1[%c0, %c0_0] : memref<3x128xf32, #tpu.memory_space<vmem>>, vector<3x128xf32>
    %cst = arith.constant 1.000000e+00 : f32
    %1 = vector.broadcast %cst : f32 to vector<3x128xf32>
    %2 = arith.mulf %0, %1 : vector<3x128xf32>
    %cst_1 = arith.constant 2.000000e+00 : f32
    %3 = vector.broadcast %cst_1 : f32 to vector<3x128xf32>
    %4 = arith.mulf %0, %3 : vector<3x128xf32>
    %cst_2 = arith.constant 4.000000e+00 : f32
    %5 = vector.broadcast %cst_2 : f32 to vector<3x128xf32>
    %6 = arith.mulf %0, %5 : vector<3x128xf32>
    %cst_3 = arith.constant 8.000000e+00 : f32
    %7 = vector.broadcast %cst_3 : f32 to vector<3x128xf32>
    %8 = arith.mulf %0, %7 : vector<3x128xf32>
    %cst_4 = arith.constant 1.600000e+01 : f32
    %9 = vector.broadcast %cst_4 : f32 to vector<3x128xf32>
    %10 = arith.mulf %0, %9 : vector<3x128xf32>
    %cst_5 = arith.constant 3.200000e+01 : f32
    %11 = vector.broadcast %cst_5 : f32 to vector<3x128xf32>
    %12 = arith.mulf %0, %11 : vector<3x128xf32>
    %13 = tpu.concatenate %2, %4, %6, %8, %10, %12 in 0 : vector<3x128xf32>, vector<3x128xf32>, vector<3x128xf32>, vector<3x128xf32>, vector<3x128xf32>, vector<3x128xf32> -> vector<18x128xf32>
    %cst_6 = arith.constant 1.000000e+00 : f32
    %14 = vector.broadcast %cst_6 : f32 to vector<1x128xf32>
    %15 = math.sin %13 : vector<18x128xf32>
    %16 = math.cos %13 : vector<18x128xf32>
    %17 = tpu.concatenate %0, %15, %16, %14 in 0 : vector<3x128xf32>, vector<18x128xf32>, vector<18x128xf32>, vector<1x128xf32> -> vector<40x128xf32>
    %18 = arith.truncf %17 : vector<40x128xf32> to vector<40x128xbf16>
    %c0_7 = arith.constant 0 : index
    %c0_8 = arith.constant 0 : index
    %19 = vector.load %arg2[%c0_7, %c0_8] : memref<256x40xbf16, #tpu.memory_space<vmem>>, vector<256x40xbf16>
    %cst_9 = arith.constant dense<0.000000e+00> : vector<256x128xf32>
    %20 = tpu.matmul %19, %18, %cst_9 {dimension_numbers = #tpu.dot_dimension_numbers<[1], [0], [0], [1], [0, 0, 1, 1], [], []>} : vector<256x40xbf16>, vector<40x128xbf16>, vector<256x128xf32> -> vector<256x128xf32>
    %21 = arith.truncf %20 : vector<256x128xf32> to vector<256x128xbf16>
    %cst_10 = arith.constant 0.000000e+00 : bf16
    %22 = vector.broadcast %cst_10 : bf16 to vector<256x128xbf16>
    %23 = arith.maximumf %21, %22 : vector<256x128xbf16>
    %c0_11 = arith.constant 0 : index
    %c0_12 = arith.constant 0 : index
    %24 = vector.load %arg3[%c0_11, %c0_12] : memref<256x256xbf16, #tpu.memory_space<vmem>>, vector<256x256xbf16>
    %cst_13 = arith.constant dense<0.000000e+00> : vector<256x128xf32>
    %25 = tpu.matmul %24, %23, %cst_13 {dimension_numbers = #tpu.dot_dimension_numbers<[1], [0], [0], [1], [0, 0, 1, 1], [], []>} : vector<256x256xbf16>, vector<256x128xbf16>, vector<256x128xf32> -> vector<256x128xf32>
    %26 = arith.truncf %25 : vector<256x128xf32> to vector<256x128xbf16>
    %c0_14 = arith.constant 0 : index
    %c0_15 = arith.constant 0 : index
    %27 = vector.load %arg4[%c0_14, %c0_15] : memref<256x1xbf16, #tpu.memory_space<vmem>>, vector<256x1xbf16>
    %28 = vector.broadcast %27 : vector<256x1xbf16> to vector<256x128xbf16>
    %29 = arith.addf %26, %28 : vector<256x128xbf16>
    %cst_16 = arith.constant 0.000000e+00 : bf16
    %30 = vector.broadcast %cst_16 : bf16 to vector<256x128xbf16>
    %31 = arith.maximumf %29, %30 : vector<256x128xbf16>
    %c0_17 = arith.constant 0 : index
    %c0_18 = arith.constant 0 : index
    %32 = vector.load %arg5[%c0_17, %c0_18] : memref<1x256xbf16, #tpu.memory_space<vmem>>, vector<1x256xbf16>
    %cst_19 = arith.constant dense<0.000000e+00> : vector<1x128xf32>
    %33 = tpu.matmul %32, %31, %cst_19 {dimension_numbers = #tpu.dot_dimension_numbers<[1], [0], [0], [1], [0, 0, 1, 1], [], []>} : vector<1x256xbf16>, vector<256x128xbf16>, vector<1x128xf32> -> vector<1x128xf32>
    %c0_20 = arith.constant 0 : index
    %c0_21 = arith.constant 0 : index
    %34 = vector.load %arg6[%c0_20, %c0_21] : memref<1x1xf32, #tpu.memory_space<vmem>>, vector<1x1xf32>
    %35 = vector.broadcast %34 : vector<1x1xf32> to vector<1x128xf32>
    %36 = arith.addf %33, %35 : vector<1x128xf32>
    %37 = arith.negf %36 : vector<1x128xf32>
    %38 = math.exp %37 : vector<1x128xf32>
    %cst_22 = arith.constant 1.000000e+00 : f32
    %39 = vector.broadcast %cst_22 : f32 to vector<1x128xf32>
    %40 = arith.addf %39, %38 : vector<1x128xf32>
    %41 = arith.divf %39, %40 : vector<1x128xf32>
    %c0_23 = arith.constant 0 : index
    %c0_24 = arith.constant 0 : index
    %42 = vector.load %arg7[%c0_23, %c0_24] : memref<1x128xf32, #tpu.memory_space<vmem>>, vector<1x128xf32>
    tpu.vector_store %arg7[%c0_23, %c0_24], %41 {strides = array<i32>} : memref<1x128xf32, #tpu.memory_space<vmem>>, vector<1x128xf32>,
    return
  }
  func.func @transform_0(%arg0: i32) -> (i32, i32) {
    %c0_i32 = arith.constant 0 : i32
    %c0_i32_0 = arith.constant 0 : i32
    return %c0_i32, %arg0 : i32, i32
  }
  func.func @transform_1(%arg0: i32) -> (i32, i32) {
    %c0_i32 = arith.constant 0 : i32
    %c0_i32_0 = arith.constant 0 : i32
    %c0_i32_1 = arith.constant 0 : i32
    return %c0_i32, %c0_i32_0 : i32, i32
  }
  func.func @transform_2(%arg0: i32) -> (i32, i32) {
    %c0_i32 = arith.constant 0 : i32
    %c0_i32_0 = arith.constant 0 : i32
    %c0_i32_1 = arith.constant 0 : i32
    return %c0_i32, %c0_i32_0 : i32, i32
  }
  func.func @transform_3(%arg0: i32) -> (i32, i32) {
    %c0_i32 = arith.constant 0 : i32
    %c0_i32_0 = arith.constant 0 : i32
    %c0_i32_1 = arith.constant 0 : i32
    return %c0_i32, %c0_i32_0 : i32, i32
  }
  func.func @transform_4(%arg0: i32) -> (i32, i32) {
    %c0_i32 = arith.constant 0 : i32
    %c0_i32_0 = arith.constant 0 : i32
    %c0_i32_1 = arith.constant 0 : i32
    return %c0_i32, %c0_i32_0 : i32, i32
  }
  func.func @transform_5(%arg0: i32) -> (i32, i32) {
    %c0_i32 = arith.constant 0 : i32
    %c0_i32_0 = arith.constant 0 : i32
    %c0_i32_1 = arith.constant 0 : i32
    return %c0_i32, %c0_i32_0 : i32, i32
  }
  func.func @transform_6(%arg0: i32) -> (i32, i32) {
    %c0_i32 = arith.constant 0 : i32
    %c0_i32_0 = arith.constant 0 : i32
    return %c0_i32, %arg0 : i32, i32
  }
}

</mosaic_0001>

<bundles_post_ra>
// kernel: ior_network_pallas.1
= control target key start
LH: loop header
LB: loop body
LE: loop exit
PB: predicated region body
PF: predicated region fallthrough
CT: control target
= control target key end

     0   :  { %vm51_vm0 = vcmask 1040384   ;;  %vm53_vm1 = vcmask 1043456   ;;  %vm55_vm2 = vcmask 1046528   ;;  %vm47_vm3 = vcmask 1042432   ;;  %s3433_s0 = inlined_call_operand.vmem [shape: f32[3,128], index: 0, kind: input, shape index: {}]   ;;  %s3434_s1 = inlined_call_operand.vmem [shape: bf16[256,40], index: 1, kind: input, shape index: {}]   ;;  %s3435_s2 = inlined_call_operand.vmem [shape: bf16[256,256], index: 2, kind: input, shape index: {}]   ;;  %s3436_s3 = inlined_call_operand.vmem [shape: bf16[256,1], index: 3, kind: input, shape index: {}]   ;;  %s3437_s5 = inlined_call_operand.<no memory space> [shape: f32[1,1], index: 5, kind: input, shape index: {}]   ;;  %s3438_s4 = inlined_call_operand.vmem [shape: bf16[1,256], index: 4, kind: input, shape index: {}]   ;;  %s3439_s6 = inlined_call_operand.vmem [shape: f32[1,128], index: 6, kind: output, shape index: {}]  }
   0x1   :  { %v2528_v0 = vld [vmem:[%s3433_s0] sm:$0x7]  ;;  %vm49_vm4 = vcmask 1045504   ;;  %vm819_vm6 = vcmask 326656   ;;  %v2481_v41 = vmov 683565275  }
   0x2   :  { %v28_v1 = vmul.f32 4.0, %v2528_v0  ;;  %v29_v2 = vmul.f32 8.0, %v2528_v0  ;;  %v30_v3 = vmul.f32 16.0, %v2528_v0  ;;  %v31_v4 = vmul.f32 32.0, %v2528_v0  ;;  %v2401_v25 = vld [vmem:[%s3434_s1] sm:$0xff]  }
   0x3   :  { %v27_v9 = vmul.f32 2.0, %v2528_v0  ;;  %2329 = vmatprep.mubr.msk.bf16.mxu0 %vm819_vm6, %v2401_v25  ;;  %v2482_v45 = vmov 2475754826   ;;  %v2483_v47 = vmov 2131351028  }
   0x4   :  { %v36_v5 = vrot.slane %v28_v1, 2  ;;  %v39_v6 = vrot.slane %v29_v2, 7  ;;  %v42_v7 = vrot.slane %v30_v3, 4  ;;  %v2534_v8 = vrot.slane %v31_v4, 1 }
   0x5   :  { %v33_v14 = vrot.slane %v27_v9, 5  ;;  %v2484_v52 = vmov 2102212464   ;;  %v2485_v59 = vmov 920167782  }
   0x6   :  { %v52_v10 = vsel %vm51_vm0, %v36_v5, %v39_v6  ;;  %v265_v11 = vand.u32 2147483647, %v2534_v8  ;;  %v268_v12 = vand.u32 2139095040, %v2534_v8  ;;  %v2486_v3 = vmov 1326507024  }
   0x7   :  { %v54_v13 = vsel %vm53_vm1, %v52_v10, %v42_v7  ;;  %v48_v21 = vsel %vm47_vm3, %v2528_v0, %v33_v14 }
   0x8   :  { %v2542_v15 = vsel %vm55_vm2, %v54_v13, %v2534_v8  ;;  %v269_v16 = vshrl.u32 %v268_v12, 23  ;;  %v272_v17 = vand.u32 8388607, %v265_v11  ;;  %v2552_v24 = vsel %vm49_vm4, %v48_v21, %v36_v5 }
   0x9   :  { %v161_v18 = vand.u32 2147483647, %v2542_v15  ;;  %v164_v19 = vand.u32 2139095040, %v2542_v15  ;;  %v60_v30 = vand.u32 2139095040, %v2552_v24 }
   0xa   :  { %v2072_v20 = vadd.s32 4294967169, %v269_v16  ;;  %v273_v26 = vor.u32 8388608, %v272_v17 }
   0xb   :  { %v165_v22 = vshrl.u32 %v164_v19, 23  ;;  %v168_v23 = vand.u32 8388607, %v161_v18  ;;  %v61_v33 = vshrl.u32 %v60_v30, 23 }
   0xc   :  { %v275_v27 = vadd.s32 1, %v2072_v20  ;;  %v2563_v37 = vshll.u32 %v273_v26, 8 }
   0xd   :  { %v2068_v28 = vadd.s32 4294967169, %v165_v22  ;;  %v169_v29 = vor.u32 8388608, %v168_v23  ;;  %v2565_v38 = vadd.s32 4294967169, %v61_v33 }
   0xe   :  { %vm276_vm5 = vcmp.gt.s32.totalorder %v275_v27, 0 }
   0xf   :  { %v171_v31 = vadd.s32 1, %v2068_v28  ;;  %v277_v32 = vsel %vm276_vm5, %v275_v27, 0  ;;  %v2559_v34 = vshll.u32 %v169_v29, 8 }
  0x10   :  { %v2561_v35 = vshrl.u32 %v277_v32, 5  ;;  %v279_v36 = vand.u32 31, %v277_v32 }
  0x11   :  { %vm172_vm7 = vcmp.gt.s32.totalorder %v171_v31, 0 }
  0x12   :  { %v173_v39 = vsel %vm172_vm7, %v171_v31, 0  ;;  %v280_v40 = vsub.s32 32, %v279_v36  ;;  %v282_v42 = vshll.u32 %v2481_v41, %v279_v36  ;;  %v285_v46 = vshll.u32 %v2482_v45, %v279_v36 }
  0x13   :  { %v174_v43 = vshrl.u32 %v173_v39, 5  ;;  %v175_v44 = vand.u32 31, %v173_v39  ;;  %v288_v48 = vshll.u32 %v2483_v47, %v279_v36  ;;  %v291_v53 = vshll.u32 %v2484_v52, %v279_v36 }
  0x14   :  { %v281_v49 = vshrl.u32 %v2481_v41, %v280_v40  ;;  %v283_v50 = vshrl.u32 %v2482_v45, %v280_v40  ;;  %v286_v51 = vshrl.u32 %v2483_v47, %v280_v40  ;;  %v289_v9 = vshrl.u32 %v2484_v52, %v280_v40 }
  0x15   :  { %v176_v54 = vsub.s32 32, %v175_v44  ;;  %v178_v55 = vshll.u32 %v2481_v41, %v175_v44  ;;  %v181_v56 = vshll.u32 %v2482_v45, %v175_v44  ;;  %v184_v57 = vshll.u32 %v2483_v47, %v175_v44 }
  0x16   :  { %v187_v58 = vshll.u32 %v2484_v52, %v175_v44  ;;  %v190_v60 = vshll.u32 %v2485_v59, %v175_v44  ;;  %vm193_vm8 = vcmp.lt.s32.totalorder %v174_v43, 1  ;;  %vm194_vm9 = vcmp.lt.s32.totalorder %v174_v43, 2 }
  0x17   :  { %v177_v61 = vshrl.u32 %v2481_v41, %v176_v54  ;;  %v179_v62 = vshrl.u32 %v2482_v45, %v176_v54  ;;  %v182_v63 = vshrl.u32 %v2483_v47, %v176_v54  ;;  %v185_v1 = vshrl.u32 %v2484_v52, %v176_v54 }
  0x18   :  { %v188_v2 = vshrl.u32 %v2485_v59, %v176_v54  ;;  %v191_v4 = vshrl.u32 %v2486_v3, %v176_v54  ;;  %vm195_vm10 = vcmp.lt.s32.totalorder %v174_v43, 3  ;;  %vm196_vm11 = vcmp.lt.s32.totalorder %v174_v43, 4 }
  0x19   :  { %v180_v5 = vor.u32 %v179_v62, %v178_v55  ;;  %v183_v6 = vor.u32 %v182_v63, %v181_v56  ;;  %v186_v7 = vor.u32 %v185_v1, %v184_v57  ;;  %v284_v13 = vor.u32 %v283_v50, %v282_v42 }
  0x1a   :  { %v189_v10 = vor.u32 %v188_v2, %v187_v58  ;;  %v192_v12 = vor.u32 %v191_v4, %v190_v60  ;;  %v287_v14 = vor.u32 %v286_v51, %v285_v46  ;;  %v292_v25 = vshrl.u32 %v2485_v59, %v280_v40 }
  0x1b   :  { %v197_v16 = vsel %vm193_vm8, %v177_v61, %v180_v5  ;;  %v198_v17 = vsel %vm196_vm11, %v186_v7, 2102212464  ;;  %v201_v19 = vsel %vm193_vm8, %v180_v5, %v183_v6  ;;  %v205_v20 = vsel %vm193_vm8, %v183_v6, %v186_v7 }
  0x1c   :  { %v199_v21 = vsel %vm195_vm10, %v183_v6, %v198_v17  ;;  %v202_v22 = vsel %vm196_vm11, %v189_v10, 920167782  ;;  %v206_v23 = vsel %vm196_vm11, %v192_v12, 1326507024  ;;  %v290_v29 = vor.u32 %v289_v9, %v288_v48 }
  0x1d   :  { %v200_v26 = vsel %vm194_vm9, %v197_v16, %v199_v21  ;;  %v203_v27 = vsel %vm195_vm10, %v186_v7, %v202_v22  ;;  %v207_v28 = vsel %vm195_vm10, %v189_v10, %v206_v23  ;;  %v293_v32 = vor.u32 %v292_v25, %v291_v53 }
  0x1e   :  { %v204_v30 = vsel %vm194_vm9, %v201_v19, %v203_v27  ;;  %v208_v31 = vsel %vm194_vm9, %v205_v20, %v207_v28  ;;  %v294_v33 = vshll.u32 %v2485_v59, %v279_v36  ;;  %v216_v50 = vmul.u32 %v2559_v34, %v200_v26 }
  0x1f   :  { %v2598_v39 = vmul.u32.u64.low %v2559_v34, %v208_v31  ;;  %v2599_v42 = vmul.u32.u64.high %v2559_v34, %v208_v31, %v2598_v39  ;;  %v2602_v44 = vmul.u32.u64.low %v2559_v34, %v204_v30  ;;  %v2603_v46 = vmul.u32.u64.high %v2559_v34, %v204_v30, %v2602_v44 }
  0x20   :  { %v295_v48 = vshrl.u32 %v2486_v3, %v280_v40  ;;  %vm297_vm12 = vcmp.lt.s32.totalorder %v2561_v35, 1  ;;  %vm298_vm13 = vcmp.lt.s32.totalorder %v2561_v35, 2  ;;  %vm299_vm14 = vcmp.lt.s32.totalorder %v2561_v35, 3 }
  0x21   :  { %vm300_vm15 = vcmp.lt.s32.totalorder %v2561_v35, 4  ;;  %v301_v36 = vsel %vm297_vm12, %v281_v49, %v284_v13  ;;  %v305_v43 = vsel %vm297_vm12, %v284_v13, %v287_v14  ;;  %v67_v55 = vadd.s32 1, %v2565_v38 }
  0x22   :  { %v296_v51 = vor.u32 %v295_v48, %v294_v33  ;;  %v302_v53 = vsel %vm300_vm15, %v290_v29, 2102212464  ;;  %v306_v54 = vsel %vm300_vm15, %v293_v32, 920167782  ;;  %vm218_vm0 = vc.u32 %v2599_v42, %v2602_v44 }
  0x23   :  { %v219_v34 = vadd.s32 1, %v2603_v46  ;;  %v303_v40 = vsel %vm299_vm14, %v287_v14, %v302_v53  ;;  %v309_v56 = vsel %vm297_vm12, %v287_v14, %v290_v29  ;;  %v307_v57 = vsel %vm299_vm14, %v290_v29, %v306_v54 }
  0x24   :  { %v310_v58 = vsel %vm300_vm15, %v296_v51, 1326507024  ;;  %vm68_vm4 = vcmp.gt.s32.totalorder %v67_v55, 0  ;;  %v304_v60 = vsel %vm298_vm13, %v301_v36, %v303_v40  ;;  %v308_v38 = vsel %vm298_vm13, %v305_v43, %v307_v57 }
  0x25   :  { %v220_v49 = vsel %vm218_vm0, %v219_v34, %v2603_v46  ;;  %v311_v61 = vsel %vm299_vm14, %v293_v32, %v310_v58  ;;  %v2630_v1 = vmul.u32.u64.low %v2563_v37, %v308_v38  ;;  %v2631_v2 = vmul.u32.u64.high %v2563_v37, %v308_v38, %v2630_v1 }
  0x26   :  { %v221_v62 = vadd.s32 %v220_v49, %v216_v50  ;;  %v312_v63 = vsel %vm298_vm13, %v309_v56, %v311_v61  ;;  %v69_v6 = vsel %vm68_vm4, %v67_v55, 0  ;;  %v320_v9 = vmul.u32 %v2563_v37, %v304_v60 }
  0x27   :  { %v2635_v4 = vmul.u32.u64.low %v2563_v37, %v312_v63  ;;  %v2636_v5 = vmul.u32.u64.high %v2563_v37, %v312_v63, %v2635_v4  ;;  %v323_v12 = vadd.s32 1, %v2631_v2  ;;  %v71_v13 = vand.u32 31, %v69_v6 }
  0x28   :  { %v222_v7 = vadd.s32 536870912, %v221_v62  ;;  %v57_v16 = vand.u32 2147483647, %v2552_v24  ;;  %v2651_v25 = vshrl.u32 %v69_v6, 5  ;;  %vm163_vm13 = vcmp.lt.s32.totalorder %v2542_v15, 0 }
  0x29   :  { %vm322_vm5 = vc.u32 %v2636_v5, %v2630_v1  ;;  %v72_v20 = vsub.s32 32, %v71_v13  ;;  %v74_v26 = vshll.u32 %v2481_v41, %v71_v13  ;;  %v77_v27 = vshll.u32 %v2482_v45, %v71_v13 }
  0x2a   :  { %v2639_v10 = vshrl.u32 %v222_v7, 30  ;;  %v324_v14 = vsel %vm322_vm5, %v323_v12, %v2631_v2  ;;  %v64_v37 = vand.u32 8388607, %v57_v16  ;;  %v83_v30 = vshll.u32 %v2484_v52, %v71_v13 }
  0x2b   :  { %v325_v17 = vadd.s32 %v324_v14, %v320_v9  ;;  %v75_v29 = vshrl.u32 %v2482_v45, %v72_v20  ;;  %v84_v31 = vshrl.u32 %v2485_v59, %v72_v20  ;;  %v78_v33 = vshrl.u32 %v2483_v47, %v72_v20 }
  0x2c   :  { %v224_v35 = vshll.u32 %v2639_v10, 30  ;;  %v80_v39 = vshll.u32 %v2483_v47, %v71_v13  ;;  %v81_v46 = vshrl.u32 %v2484_v52, %v72_v20  ;;  %v86_v48 = vshll.u32 %v2485_v59, %v71_v13 }
  0x2d   :  { %v326_v21 = vadd.s32 536870912, %v325_v17  ;;  %v87_v36 = vshrl.u32 %v2486_v3, %v72_v20  ;;  %v65_v51 = vor.u32 8388608, %v64_v37  ;;  %v217_v45 = vadd.s32 %v2602_v44, %v2599_v42 }
  0x2e   :  { %v225_v19 = vsub.s32 %v221_v62, %v224_v35  ;;  %v76_v54 = vor.u32 %v75_v29, %v74_v26  ;;  %v85_v55 = vor.u32 %v84_v31, %v83_v30  ;;  %v79_v40 = vor.u32 %v78_v33, %v77_v27 }
  0x2f   :  { %v2649_v23 = vshrl.u32 %v326_v21, 30  ;;  %v82_v56 = vor.u32 %v81_v46, %v80_v39  ;;  %vm92_vm7 = vcmp.lt.s32.totalorder %v2651_v25, 4  ;;  %v73_v47 = vshrl.u32 %v2481_v41, %v72_v20 }
  0x30   :  { %v227_v22 = vsub.s32 0, %v225_v19  ;;  %v88_v52 = vor.u32 %v87_v36, %v86_v48  ;;  %vm89_vm9 = vcmp.lt.s32.totalorder %v2651_v25, 1  ;;  %vm91_vm10 = vcmp.lt.s32.totalorder %v2651_v25, 3 }
  0x31   :  { %v328_v32 = vshll.u32 %v2649_v23, 30  ;;  %v94_v42 = vsel %vm92_vm7, %v82_v56, 2102212464  ;;  %v98_v49 = vsel %vm92_vm7, %v85_v55, 920167782  ;;  %vm90_vm11 = vcmp.lt.s32.totalorder %v2651_v25, 2 }
  0x32   :  { %v2069_v28 = vmin.u32 %v227_v22, %v225_v19  ;;  %v97_v41 = vsel %vm89_vm9, %v76_v54, %v79_v40  ;;  %v105_v38 = vshll.u32 %v65_v51, 8  ;;  %v321_v63 = vadd.s32 %v2630_v1, %v2636_v5 }
  0x33   :  { %v329_v43 = vsub.s32 %v325_v17, %v328_v32  ;;  %v93_v2 = vsel %vm89_vm9, %v73_v47, %v76_v54  ;;  %v95_v6 = vsel %vm91_vm10, %v79_v40, %v94_v42  ;;  %v99_v7 = vsel %vm91_vm10, %v82_v56, %v98_v49 }
  0x34   :  { %v229_v50 = vclz %v2069_v28  ;;  %v101_v9 = vsel %vm89_vm9, %v79_v40, %v82_v56  ;;  %v100_v35 = vsel %vm90_vm11, %v97_v41, %v99_v7  ;;  %v102_v1 = vsel %vm92_vm7, %v88_v52, 1326507024 }
  0x35   :  { %v331_v34 = vsub.s32 0, %v329_v43  ;;  %v103_v5 = vsel %vm91_vm10, %v85_v55, %v102_v1  ;;  %v2693_v14 = vmul.u32.u64.low %v105_v38, %v100_v35  ;;  %v2694_v17 = vmul.u32.u64.high %v105_v38, %v100_v35, %v2693_v14 }
  0x36   :  { %v2070_v53 = vadd.s32 4294967294, %v229_v50  ;;  %v104_v22 = vsel %vm90_vm11, %v101_v9, %v103_v5  ;;  %v96_v28 = vsel %vm90_vm11, %v93_v2, %v95_v6  ;;  %vm2708_vm14 = vcmp.le.f32.partialorder %v161_v18, 0.7853982 }
  0x37   :  { %v2073_v3 = vmin.u32 %v331_v34, %v329_v43  ;;  %v2701_v30 = vmul.u32.u64.low %v105_v38, %v104_v22  ;;  %v2702_v31 = vmul.u32.u64.high %v105_v38, %v104_v22, %v2701_v30  ;;  %v115_v39 = vadd.s32 1, %v2694_v17 }
  0x38   :  { %vm2071_vm8 = vcmp.lt.s32.totalorder %v2070_v53, 0  ;;  %v112_v50 = vmul.u32 %v105_v38, %v96_v28  ;;  %v247_v34 = vsub.s32 4, %v2639_v10  ;;  %vm267_vm0 = vcmp.lt.s32.totalorder %v2534_v8, 0 }
  0x39   :  { %v232_v59 = vsel %vm2071_vm8, 0, %v2070_v53  ;;  %v333_v60 = vclz %v2073_v3  ;;  %vm114_vm15 = vc.u32 %v2702_v31, %v2693_v14  ;;  %vm2729_vm4 = vcmp.le.f32.partialorder %v265_v11, 0.7853982 }
  0x3a   :  { %v233_v44 = vsub.s32 32, %v232_v59  ;;  %v234_v57 = vshll.u32 %v225_v19, %v232_v59  ;;  %v237_v58 = vsub.s32 4294967266, %v232_v59  ;;  %v116_v53 = vsel %vm114_vm15, %v115_v39, %v2694_v17 }
  0x3b   :  { %v2074_v4 = vadd.s32 4294967294, %v333_v60  ;;  %v117_v55 = vadd.s32 %v116_v53, %v112_v50  ;;  %v248_v59 = vsel %vm163_vm13, %v247_v34, %v2639_v10  ;;  %v351_v49 = vsub.s32 4, %v2649_v23 }
  0x3c   :  { %v235_v61 = vshrl.u32 %v217_v45, %v233_v44  ;;  %v238_v62 = vadd.s32 127, %v237_v58  ;;  %v250_v58 = vsel %vm2708_vm14, 0, %v248_v59  ;;  %vm253_vm10 = vweird.f32 %v2542_v15 }
  0x3d   :  { %vm2075_vm12 = vcmp.lt.s32.totalorder %v2074_v4, 0  ;;  %v118_v56 = vadd.s32 536870912, %v117_v55  ;;  %v565_v41 = vand.u32 3, %v250_v58  ;;  %v352_v38 = vsel %vm267_vm0, %v351_v49, %v2649_v23 }
  0x3e   :  { %v236_v12 = vor.u32 %v235_v61, %v234_v57  ;;  %v239_v13 = vshll.u32 %v238_v62, 23  ;;  %v336_v21 = vsel %vm2075_vm12, 0, %v2074_v4  ;;  %v354_v2 = vsel %vm2729_vm4, 0, %v352_v38 }
  0x3f   :  { %v337_v37 = vsub.s32 32, %v336_v21  ;;  %v338_v26 = vshll.u32 %v329_v43, %v336_v21  ;;  %v341_v27 = vsub.s32 4294967266, %v336_v21  ;;  %v2722_v52 = vshrl.u32 %v118_v56, 30 }
  0x40   :  { %v240_v19 = vor.u32 4788187, %v239_v13  ;;  %v243_v20 = vcvt.s32.f32 %v236_v12  ;;  %vm570_vm5 = vcmp.eq.s32.totalorder %v565_v41, 2  ;;  %vm567_vm7 = vcmp.eq.s32.totalorder %v565_v41, 0 }
  0x41   :  { %v339_v32 = vshrl.u32 %v321_v63, %v337_v37  ;;  %v342_v33 = vadd.s32 127, %v341_v27  ;;  %v120_v44 = vshll.u32 %v2722_v52, 30  ;;  %vm566_vm8 = vcmp.lt.s32.totalorder %v565_v41, 2 }
  0x42   :  { %v241_v29 = vand.u32 2147483647, %v240_v19  ;;  %v668_v12 = vand.u32 3, %v354_v2  ;;  %v113_v13 = vadd.s32 %v2693_v14, %v2702_v31  ;;  %vm692_vm15 = vcmask 1044480  }
  0x43   :  { %v340_v48 = vor.u32 %v339_v32, %v338_v26  ;;  %v343_v36 = vshll.u32 %v342_v33, 23  ;;  %v121_v10 = vsub.s32 %v117_v55, %v120_v44  ;;  %v358_v53 = vadd.s32 3, %v354_v2 }
  0x44   :  { %v244_v46 = vmul.f32 %v243_v20, %v241_v29  ;;  %vm673_vm11 = vcmp.eq.s32.totalorder %v668_v12, 2  ;;  %vm670_vm12 = vcmp.eq.s32.totalorder %v668_v12, 0 }
  0x45   :  { %v344_v51 = vor.u32 4788187, %v343_v36  ;;  %v347_v45 = vcvt.s32.f32 %v340_v48  ;;  %v123_v11 = vsub.s32 0, %v121_v10  ;;  %v359_v3 = vand.u32 3, %v358_v53  ;;  %v2433_v53 = vld [vmem:[%s3435_s2 + $0x4] ss:$8 sps:$4 sm:$0xff]  }
  0x46   :  { %v245_v25 = vxor.u32 2147483648, %v244_v46 }
  0x47   :  { %v345_v40 = vand.u32 2147483647, %v344_v51  ;;  %v2065_v61 = vmin.u32 %v123_v11, %v121_v10 }
  0x48   :  { %v246_v54 = vsel %vm163_vm13, %v245_v25, %v244_v46  ;;  %vm669_vm13 = vcmp.lt.s32.totalorder %v668_v12, 2 }
  0x49   :  { %v249_v18 = vsel %vm2708_vm14, %v2542_v15, %v246_v54  ;;  %v348_v47 = vmul.f32 %v347_v45, %v345_v40  ;;  %v125_v62 = vclz %v2065_v61  ;;  %vm357_vm14 = vweird.f32 %v2534_v8 }
  0x4a   :  { %2465 = vcosq.f32 %v249_v18  ;;  %v254_v45 = vadd.s32 3, %v250_v58  ;;  %v143_v40 = vsub.s32 4, %v2722_v52 }
  0x4b   :  { %2467 = vsinq.f32 %v249_v18  ;;  %v349_v42 = vxor.u32 2147483648, %v348_v47  ;;  %v2066_v7 = vadd.s32 4294967294, %v125_v62 }
  0x4c   :  { %v255_v59 = vand.u32 3, %v254_v45  ;;  %v2419_v45 = vld [vmem:[%s3435_s2 + $0x44] ss:$8 sps:$4 sm:$0xff]  }
  0x4d   :  { %v350_v57 = vsel %vm267_vm0, %v349_v42, %v348_v47  ;;  %vm2067_vm9 = vcmp.lt.s32.totalorder %v2066_v7, 0  ;;  %vm59_vm0 = vcmp.lt.s32.totalorder %v2552_v24, 0  ;;  %1320 = vmatprep.mubr.bf16.mxu1 %v2419_v45 }
  0x4e   :  { %v353_v60 = vsel %vm2729_vm4, %v2534_v8, %v350_v57  ;;  %v128_v1 = vsel %vm2067_vm9, 0, %v2066_v7  ;;  %vm2773_vm4 = vcmp.le.f32.partialorder %v57_v16, 0.7853982  ;;  %v144_v16 = vsel %vm59_vm0, %v143_v40, %v2722_v52 }
  0x4f   :  { %2469 = vcosq.f32 %v353_v60  ;;  %v129_v5 = vsub.s32 32, %v128_v1  ;;  %v130_v17 = vshll.u32 %v121_v10, %v128_v1  ;;  %v133_v20 = vsub.s32 4294967266, %v128_v1 }
  0x50   :  { %2471 = vsinq.f32 %v353_v60  ;;  %v146_v44 = vsel %vm2773_vm4, 0, %v144_v16  ;;  %vm360_vm9 = vcmp.lt.s32.totalorder %v359_v3, 2 }
  0x51   :  { %v131_v22 = vshrl.u32 %v113_v13, %v129_v5  ;;  %v134_v27 = vadd.s32 127, %v133_v20  ;;  %v150_v57 = vadd.s32 3, %v146_v44  ;;  %v462_v41 = vand.u32 3, %v146_v44 }
  0x53   :  { %v132_v29 = vor.u32 %v131_v22, %v130_v17  ;;  %v135_v31 = vshll.u32 %v134_v27, 23  ;;  %v151_v38 = vand.u32 3, %v150_v57 }
  0x55   :  { %v136_v46 = vor.u32 4788187, %v135_v31  ;;  %v139_v50 = vcvt.s32.f32 %v132_v29  ;;  %v2405_v29 = vld [vmem:[%s3434_s1 + $0x20] sm:$0xff]   ;;  %v2407_v31 = vld [vmem:[%s3434_s1 + $0x30] sm:$0xff]  }
  0x57   :  { %v2741_v63 = vpop.eup %2465  ;;  %v137_v43 = vand.u32 2147483647, %v136_v46  ;;  %v2411_v46 = vld [vmem:[%s3434_s1 + $0x50] sm:$0xff]  }
  0x58   :  { %v2745_v4 = vpop.eup %2467  ;;  %v261_v6 = vxor.u32 2147483648, %v2741_v63 }
  0x59   :  { %v258_v9 = vxor.u32 2147483648, %v2745_v4  ;;  %v140_v51 = vmul.f32 %v139_v50, %v137_v43  ;;  %v2412_v50 = vld [vmem:[%s3434_s1 + $0x58] sm:$0xff]   ;;  %v2415_v43 = vld [vmem:[%s3434_s1 + $0x70] sm:$0xff]  }
  0x5a   :  { %v572_v23 = vsel %vm570_vm5, %v261_v6, %v2745_v4  ;;  %vm260_vm5 = vcmp.eq.s32.totalorder %v255_v59, 2 }
  0x5b   :  { %v569_v35 = vsel %vm567_vm7, %v2741_v63, %v258_v9  ;;  %v141_v18 = vxor.u32 2147483648, %v140_v51  ;;  %vm361_vm7 = vcmp.eq.s32.totalorder %v359_v3, 0  ;;  %v262_v49 = vsel %vm260_vm5, %v261_v6, %v2745_v4 }
  0x5c   :  { %v573_v19 = vsel %vm566_vm8, %v569_v35, %v572_v23  ;;  %v2470_v21 = vpop.eup %2469  ;;  %vm364_vm8 = vcmp.eq.s32.totalorder %v359_v3, 2  ;;  %vm149_vm5 = vweird.f32 %v2552_v24  ;;  %v1463_v3 = vld [vmem:[%s3436_s3 + $0x78] sm:$0xf] }
  0x5d   :  { %v2472_v37 = vpop.eup %2471  ;;  %v365_v26 = vxor.u32 2147483648, %v2470_v21  ;;  %v2760_v28 = vsel %vm253_vm10, nan, %v573_v19  ;;  %v142_v47 = vsel %vm59_vm0, %v141_v18, %v140_v51  ;;  %vm464_vm0 = vcmp.eq.s32.totalorder %v462_v41, 0 }
  0x5e   :  { %v362_v14 = vxor.u32 2147483648, %v2472_v37  ;;  %v694_v39 = vrot.slane %v2760_v28, 3  ;;  %v145_v42 = vsel %vm2773_vm4, %v2552_v24, %v142_v47  ;;  %vm153_vm4 = vcmp.eq.s32.totalorder %v151_v38, 0  ;;  %v2403_v28 = vld [vmem:[%s3434_s1 + $0x10] sm:$0xff]  }
  0x5f   :  { %v675_v30 = vsel %vm673_vm11, %v365_v26, %v2472_v37  ;;  %2473 = vcosq.f32 %v145_v42  ;;  %v366_v60 = vsel %vm364_vm8, %v365_v26, %v2472_v37  ;;  %vm467_vm11 = vcmp.eq.s32.totalorder %v462_v41, 2 }
  0x60   :  { %v672_v32 = vsel %vm670_vm12, %v2470_v21, %v362_v14  ;;  %2475 = vsinq.f32 %v145_v42  ;;  %v363_v52 = vsel %vm361_vm7, %v2470_v21, %v362_v14  ;;  %vm156_vm12 = vcmp.eq.s32.totalorder %v151_v38, 2  ;;  %v2402_v14 = vld [vmem:[%s3434_s1 + $0x8] sm:$0xff]   ;;  %v1447_v42 = vld [vmem:[%s3436_s3 + $0x38] sm:$0xf] }
  0x61   :  { %v676_v33 = vsel %vm669_vm13, %v672_v32, %v675_v30  ;;  %v367_v11 = vsel %vm360_vm9, %v363_v52, %v366_v60  ;;  %vm463_vm13 = vcmp.lt.s32.totalorder %v462_v41, 2  ;;  %v2406_v30 = vld [vmem:[%s3434_s1 + $0x28] sm:$0xff]   ;;  %v2408_v32 = vld [vmem:[%s3434_s1 + $0x38] sm:$0xff]   ;;  %v3440_v51 = vmov 0   ;;  %v1462_v41 = vld [vmem:[%s3436_s3 + $0x74] sm:$0xf] }
  0x62   :  { %v677_v48 = vsel %vm357_vm14, nan, %v676_v33  ;;  %v368_v62 = vsel %vm357_vm14, nan, %v367_v11  ;;  %v2409_v33 = vld [vmem:[%s3434_s1 + $0x40] sm:$0xff]   ;;  %2400 = vset.pattern.permute.xlu1 %v3440_v51  ;;  %2399 = vset.pattern.permute.xlu0 %v3440_v51  ;;  %v1464_v52 = vld [vmem:[%s3436_s3 + $0x7c] sm:$0xf] }
  0x63   :  { %v696_v36 = vrot.slane %v677_v48, 3  ;;  %v684_v4 = vrot.slane %v368_v62, 5  ;;  %v2413_v48 = vld [vmem:[%s3434_s1 + $0x60] sm:$0xff]   ;;  %1827 = vperm.xlu0 %2399, %v1463_v3   ;;  %1635 = vperm.xlu1 %2400, %v1447_v42   ;;  %v1448_v60 = vld [vmem:[%s3436_s3 + $0x3c] sm:$0xf] }
  0x64   :  { %v1461_v11 = vld [vmem:[%s3436_s3 + $0x70] sm:$0xf] }
  0x65   :  { %v697_v25 = vsel %vm692_vm15, %v694_v39, %v696_v36  ;;  %v2414_v36 = vld [vmem:[%s3434_s1 + $0x68] sm:$0xff]  }
  0x66   :  { %v703_v54 = vsel %vm55_vm2, %v697_v25, 1.0  ;;  %vm257_vm2 = vcmp.eq.s32.totalorder %v255_v59, 0  ;;  %v2416_v25 = vld [vmem:[%s3434_s1 + $0x78] sm:$0xff]  }
  0x67   :  { %v706_v55 = vpack.c.bf16 %v703_v54, %v703_v54  ;;  %v259_v58 = vsel %vm257_vm2, %v2741_v63, %v258_v9  ;;  %vm152_vm2 = vcmp.lt.s32.totalorder %v151_v38, 2  ;;  %1839 = vperm.xlu0 %2399, %v1464_v52   ;;  %1647 = vperm.xlu1 %2400, %v1448_v60  }
  0x69   :  { %2377 = vmatprep.subr.msk.bf16.mxu0 %vm53_vm1, %v706_v55  ;;  %v869_v56 = vsel %vm53_vm1, %v706_v55, 0  ;;  %vm256_vm1 = vcmp.lt.s32.totalorder %v255_v59, 2 }
  0x6a   :  { %2324 = vmatpush3.bf16.msra.mxu0 %v869_v56  ;;  %v263_v10 = vsel %vm256_vm1, %v259_v58, %v262_v49 }
  0x6b   :  { %v264_v61 = vsel %vm253_vm10, nan, %v263_v10  ;;  %1803 = vperm.xlu0 %2399, %v1461_v11   ;;  %1815 = vperm.xlu1 %2400, %v1462_v41  }
  0x6c   :  { %v2474_v2 = vpop.eup %2473  ;;  %v682_v63 = vrot.slane %v264_v61, 5 }
  0x6d   :  { %v2476_v7 = vpop.eup %2475  ;;  %v157_v9 = vxor.u32 2147483648, %v2474_v2 }
  0x6e   :  { %v154_v6 = vxor.u32 2147483648, %v2476_v7  ;;  %v685_v5 = vsel %vm47_vm3, %v682_v63, %v684_v4  ;;  %v1459_v4 = vld [vmem:[%s3436_s3 + $0x68] sm:$0xf] }
  0x6f   :  { %v469_v23 = vsel %vm467_vm11, %v157_v9, %v2476_v7  ;;  %v158_v15 = vsel %vm156_vm12, %v157_v9, %v2476_v7  ;;  %v1445_v7 = vld [vmem:[%s3436_s3 + $0x30] sm:$0xf] }
  0x70   :  { %v466_v12 = vsel %vm464_vm0, %v2474_v2, %v154_v6  ;;  %v155_v13 = vsel %vm153_vm4, %v2474_v2, %v154_v6  ;;  %v1446_v2 = vld [vmem:[%s3436_s3 + $0x34] sm:$0xf]  ;;  %1611 = vperm.xlu0 %2399, %v1445_v7  }
  0x71   :  { %v470_v8 = vsel %vm463_vm13, %v466_v12, %v469_v23  ;;  %v159_v35 = vsel %vm152_vm2, %v155_v13, %v158_v15  ;;  %1623 = vperm.xlu1 %2400, %v1446_v2   ;;  %v1444_v12 = vld [vmem:[%s3436_s3 + $0x2c] sm:$0xf]  ;;  %v1443_v13 = vld [vmem:[%s3436_s3 + $0x28] sm:$0xf] }
  0x72   :  { %v471_v1 = vsel %vm149_vm5, nan, %v470_v8  ;;  %v160_v17 = vsel %vm149_vm5, nan, %v159_v35  ;;  %v1458_v35 = vld [vmem:[%s3436_s3 + $0x64] sm:$0xf]  ;;  %v1451_v2 = vld [vmem:[%s3436_s3 + $0x48] sm:$0xf] }
  0x73   :  { %v693_v19 = vrot.slane %v471_v1, 3  ;;  %v681_v20 = vrot.slane %v160_v17, 5  ;;  %v1457_v1 = vld [vmem:[%s3436_s3 + $0x60] sm:$0xf] }
  0x74   :  { %1779 = vperm.xlu0 %2399, %v1459_v4  }
  0x75   :  { %v695_v21 = vsel %vm692_vm15, %v693_v19, %v694_v39  ;;  %v702_v22 = vsel %vm692_vm15, %v685_v5, %v693_v19  ;;  %v683_v24 = vsel %vm47_vm3, %v681_v20, %v682_v63  ;;  %v701_v37 = vsel %vm47_vm3, %v2528_v0, %v681_v20  ;;  %v2404_v0 = vld [vmem:[%s3434_s1 + $0x18] sm:$0xff]   ;;  %v2410_v39 = vld [vmem:[%s3434_s1 + $0x48] sm:$0xff]   ;;  %v1442_v20 = vld [vmem:[%s3436_s3 + $0x24] sm:$0xf] }
  0x76   :  { %v705_v26 = vpack.c.bf16 %v695_v21, %v702_v22  ;;  %v704_v27 = vpack.c.bf16 %v683_v24, %v701_v37  ;;  %v1460_v63 = vld [vmem:[%s3436_s3 + $0x6c] sm:$0xf]  ;;  %v1441_v21 = vld [vmem:[%s3436_s3 + $0x20] sm:$0xf] }
  0x77   :  { %1791 = vperm.xlu1 %2400, %v1460_v63  }
  0x78   :  { %2325 = vmatprep.subr.bf16.mxu0 %v705_v26  ;;  %1587 = vperm.xlu0 %2399, %v1443_v13  }
  0x79   :  { %2326 = vmatpush3.bf16.msra.mxu0 %v705_v26 }
  0x7a   :  { %2327 = vmatprep.subr.bf16.mxu0 %v704_v27 }
  0x7b   :  { %1599 = vperm.xlu1 %2400, %v1444_v12  }
  0x7c   :  { %1755 = vperm.xlu0 %2399, %v1457_v1   ;;  %v1449_v1 = vld [vmem:[%s3436_s3 + $0x40] sm:$0xf] }
  0x7d   :  { %2328 = vmatpush3.bf16.msra.mxu0 %v704_v27  ;;  %v1456_v27 = vld [vmem:[%s3436_s3 + $0x5c] sm:$0xf] }
  0x7f   :  { %1767 = vperm.xlu1 %2400, %v1458_v35   ;;  %v1450_v35 = vld [vmem:[%s3436_s3 + $0x44] sm:$0xf] }
  0x80   :  { %2330 = vmatmul.mubr.msk.bf16.vlgmr.msra.gmra.mxu0 %vm819_vm6, %v2402_v14  ;;  %1563 = vperm.xlu0 %2399, %v1441_v21   ;;  %v1455_v14 = vld [vmem:[%s3436_s3 + $0x58] sm:$0xf]  ;;  %v1434_v21 = vld [vmem:[%s3436_s3 + $0x4] sm:$0xf] }
  0x81   :  { %2333 = vmatprep.mubr.msk.bf16.mxu0 %vm819_vm6, %v2403_v28 }
  0x83   :  { %1575 = vperm.xlu1 %2400, %v1442_v20   ;;  %v1433_v20 = vld [vmem:[%s3436_s3] sm:$0xf] }
  0x84   :  { %1731 = vperm.xlu0 %2399, %v1455_v14   ;;  %v2449_v14 = vld [vmem:[%s3435_s2 + $0x34] ss:$8 sps:$4 sm:$0xff]  }
  0x87   :  { %1743 = vperm.xlu1 %2400, %v1456_v27  }
  0x88   :  { %2334 = vmatmul.mubr.msk.bf16.gmra.mxu0 %vm819_vm6, %v2404_v0  ;;  %v1440_v0 = vld [vmem:[%s3436_s3 + $0x1c] sm:$0xf] }
  0x89   :  { %2337 = vmatprep.mubr.msk.bf16.mxu0 %vm819_vm6, %v2405_v29  ;;  %v1439_v29 = vld [vmem:[%s3436_s3 + $0x18] sm:$0xf] }
  0x8a   :  { %1539 = vperm.xlu0 %2399, %v1439_v29   ;;  %v2429_v29 = vld [vmem:[%s3435_s2 + $0x84] ss:$8 sps:$4 sm:$0xff]  }
  0x8b   :  { %1551 = vperm.xlu1 %2400, %v1440_v0   ;;  %v2452_v0 = vld [vmem:[%s3435_s2 + $0x30] ss:$8 sps:$4 sm:$0xff]  }
  0x90   :  { %2338 = vmatmul.mubr.msk.bf16.gmra.mxu0 %vm819_vm6, %v2406_v30 }
  0x91   :  { %2341 = vmatprep.mubr.msk.bf16.mxu0 %vm819_vm6, %v2407_v31 }
  0x98   :  { %2342 = vmatmul.mubr.msk.bf16.gmra.mxu0 %vm819_vm6, %v2408_v32 }
  0x99   :  { %2345 = vmatprep.mubr.msk.bf16.mxu0 %vm819_vm6, %v2409_v33  ;;  %v1454_v33 = vld [vmem:[%s3436_s3 + $0x54] sm:$0xf] }
  0x9a   :  { %1719 = vperm.xlu1 %2400, %v1454_v33   ;;  %v2441_v33 = vld [vmem:[%s3435_s2 + $0xa4] ss:$8 sps:$4 sm:$0xff]  }
  0xa0   :  { %2346 = vmatmul.mubr.msk.bf16.gmra.mxu0 %vm819_vm6, %v2410_v39  ;;  %v1453_v39 = vld [vmem:[%s3436_s3 + $0x50] sm:$0xf] }
  0xa1   :  { %2349 = vmatprep.mubr.msk.bf16.mxu0 %vm819_vm6, %v2411_v46  ;;  %1707 = vperm.xlu0 %2399, %v1453_v39   ;;  %v2445_v39 = vld [vmem:[%s3435_s2 + $0xa0] ss:$8 sps:$4 sm:$0xff]  }
  0xa8   :  { %2350 = vmatmul.mubr.msk.bf16.gmra.mxu0 %vm819_vm6, %v2412_v50  ;;  %v11_v50 = vstv %s3437_s5 }
  0xa9   :  { %2353 = vmatprep.mubr.msk.bf16.mxu0 %vm819_vm6, %v2413_v48  ;;  %v1438_v48 = vld [vmem:[%s3436_s3 + $0x14] sm:$0xf]  ;;  %12 = vst [vmem:[#allocation2] sm:$0x1] %v11_v50  ;;  %v2451_v50 = vld [vmem:[%s3435_s2 + $0xb0] ss:$8 sps:$4 sm:$0xff]  }
  0xaa   :  { %1527 = vperm.xlu1 %2400, %v1438_v48   ;;  %v2453_v48 = vld [vmem:[%s3435_s2 + $0xc4] ss:$8 sps:$4 sm:$0xff]  }
  0xb0   :  { %2354 = vmatmul.mubr.msk.bf16.gmra.mxu0 %vm819_vm6, %v2414_v36  ;;  %v1437_v36 = vld [vmem:[%s3436_s3 + $0x10] sm:$0xf] }
  0xb1   :  { %2357 = vmatprep.mubr.msk.bf16.mxu0 %vm819_vm6, %v2415_v43  ;;  %1515 = vperm.xlu0 %2399, %v1437_v36   ;;  %v2455_v36 = vld [vmem:[%s3435_s2 + $0xc0] ss:$8 sps:$4 sm:$0xff]  }
  0xb5   :  { %1683 = vperm.xlu0 %2399, %v1451_v2  }
  0xb8   :  { %2358 = vmatmul.mubr.msk.bf16.gmra.mxu0 %vm819_vm6, %v2416_v25 }
  0xb9   :  { %1288 = vmatprep.mubr.bf16.mxu0 %v2433_v53 }
 0x140   :  { %v2873_v54 = vpop.f32.mrf.mxu0 }
 0x142   :  { %v2875_v55 = vpop.f32.mrf.mxu0 }
 0x144   :  { %v2877_v34 = vpop.f32.mrf.mxu0 }
 0x145   :  { %v1033_v18 = vpack.c.bf16 %v2877_v34, %v2873_v54  ;;  %v2431_v54 = vld [vmem:[%s3435_s2] ss:$8 sps:$4 sm:$0xff]   ;;  %v2420_v34 = vld [vmem:[%s3435_s2 + $0x54] ss:$8 sps:$4 sm:$0xff]  }
 0x146   :  { %v2881_v40 = vpop.f32.mrf.mxu0 }
 0x147   :  { %v1032_v56 = vpack.c.bf16 %v2881_v40, %v2875_v55  ;;  %v2437_v55 = vld [vmem:[%s3435_s2 + $0x14] ss:$8 sps:$4 sm:$0xff]   ;;  %v2440_v40 = vld [vmem:[%s3435_s2 + $0x10] ss:$8 sps:$4 sm:$0xff]  }
 0x148   :  { %v2885_v47 = vpop.f32.mrf.mxu0 }
 0x14a   :  { %v2887_v59 = vpop.f32.mrf.mxu0 }
 0x14c   :  { %v2895_v16 = vpop.f32.mrf.mxu0 }
 0x14d   :  { %v1035_v44 = vpack.c.bf16 %v2895_v16, %v2885_v47 }
 0x14e   :  { %v2899_v57 = vpop.f32.mrf.mxu0 }
 0x14f   :  { %v1034_v58 = vpack.c.bf16 %v2899_v57, %v2887_v59  ;;  %v1048_v59 = vmax.bf16 %v3440_v51, %v1032_v56  ;;  %v2417_v57 = vld [vmem:[%s3435_s2 + $0x40] ss:$8 sps:$4 sm:$0xff]   ;;  %v2423_v56 = vld [vmem:[%s3435_s2 + $0x64] ss:$8 sps:$4 sm:$0xff]  }
 0x150   :  { %v2903_v49 = vpop.f32.mrf.mxu0 }
 0x151   :  { %v1050_v27 = vmax.bf16 %v3440_v51, %v1034_v58  ;;  %v2443_v58 = vld [vmem:[%s3435_s2 + $0x24] ss:$8 sps:$4 sm:$0xff]  }
 0x152   :  { %v2911_v10 = vpop.f32.mrf.mxu0 }
 0x154   :  { %v2919_v38 = vpop.f32.mrf.mxu0 }
 0x155   :  { %v1037_v7 = vpack.c.bf16 %v2919_v38, %v2903_v49 }
 0x156   :  { %v2921_v61 = vpop.f32.mrf.mxu0 }
 0x157   :  { %v1053_v49 = vmax.bf16 %v3440_v51, %v1037_v7  ;;  %v1036_v38 = vpack.c.bf16 %v2921_v61, %v2911_v10  ;;  %v3164_v7 = vld.sshfl [vmem:[%s3438_s4] sm:$0x11 pattern:$0x75316420] }
 0x158   :  { %v2923_v62 = vpop.f32.mrf.mxu0  ;;  %3458 = vst [vmem:[#allocation4_spill] sm:$0xff] %v3164_v7 }
 0x159   :  { %v1052_v10 = vmax.bf16 %v3440_v51, %v1036_v38 }
 0x15a   :  { %v2931_v9 = vpop.f32.mrf.mxu0 }
 0x15c   :  { %v2344_v6 = vpop.f32.mrf.mxu0 }
 0x15d   :  { %v1039_v43 = vpack.c.bf16 %v2344_v6, %v2923_v62  ;;  %v1452_v62 = vld [vmem:[%s3436_s3 + $0x4c] sm:$0xf] }
 0x15e   :  { %v2939_v23 = vpop.f32.mrf.mxu0  ;;  %1695 = vperm.xlu1 %2400, %v1452_v62   ;;  %v1436_v6 = vld [vmem:[%s3436_s3 + $0xc] sm:$0xf] }
 0x15f   :  { %v1055_v52 = vmax.bf16 %v3440_v51, %v1039_v43  ;;  %v1038_v60 = vpack.c.bf16 %v2939_v23, %v2931_v9  ;;  %v1435_v23 = vld [vmem:[%s3436_s3 + $0x8] sm:$0xf]  ;;  %v2456_v43 = vld [vmem:[%s3435_s2 + $0xd4] ss:$8 sps:$4 sm:$0xff]  }
 0x160   :  { %v2941_v15 = vpop.f32.mrf.mxu0  ;;  %1491 = vperm.xlu0 %2399, %v1435_v23  }
 0x161   :  { %v1054_v9 = vmax.bf16 %v3440_v51, %v1038_v60  ;;  %v2488_v60 = vmov 1966171168  }
 0x162   :  { %v2949_v8 = vpop.f32.mrf.mxu0  ;;  %1503 = vperm.xlu1 %2400, %v1436_v6  }
 0x164   :  { %v2957_v5 = vpop.f32.mrf.mxu0  ;;  %1659 = vperm.xlu0 %2399, %v1449_v1   ;;  %v2489_v1 = vmov 839922192  }
 0x166   :  { %v2959_v17 = vpop.f32.mrf.mxu0  ;;  %1671 = vperm.xlu1 %2400, %v1450_v35  }
 0x167   :  { %v1040_v16 = vpack.c.bf16 %v2959_v17, %v2949_v8  ;;  %v2425_v8 = vld [vmem:[%s3435_s2 + $0x60] ss:$8 sps:$4 sm:$0xff]   ;;  %v2426_v17 = vld [vmem:[%s3435_s2 + $0x74] ss:$8 sps:$4 sm:$0xff]  }
 0x168   :  { %v2961_v19 = vpop.f32.mrf.mxu0  ;;  %1467 = vperm.xlu0 %2399, %v1433_v20  }
 0x16a   :  { %v2969_v22 = vpop.f32.mrf.mxu0  ;;  %1479 = vperm.xlu1 %2400, %v1434_v21  }
 0x16c   :  { %v2971_v24 = vpop.f32.mrf.mxu0 }
 0x16d   :  { %v1043_v12 = vpack.c.bf16 %v2971_v24, %v2961_v19  ;;  %v1051_v24 = vmax.bf16 %v3440_v51, %v1035_v44  ;;  %v1049_v44 = vmax.bf16 %v3440_v51, %v1033_v18  ;;  %v2422_v18 = vld [vmem:[%s3435_s2 + $0x50] ss:$8 sps:$4 sm:$0xff]  }
 0x16e   :  { %v2973_v37 = vpop.f32.mrf.mxu0 }
 0x16f   :  { %v1059_v61 = vmax.bf16 %v3440_v51, %v1043_v12  ;;  %v1042_v19 = vpack.c.bf16 %v2973_v37, %v2969_v22  ;;  %v1041_v22 = vpack.c.bf16 %v2957_v5, %v2941_v15  ;;  %v1056_v15 = vmax.bf16 %v3440_v51, %v1040_v16  ;;  %v2446_v5 = vld [vmem:[%s3435_s2 + $0x20] ss:$8 sps:$4 sm:$0xff]  }
 0x170   :  { %v2355_v26 = vpop.f32.mrf.mxu0 }
 0x171   :  { %v1058_v37 = vmax.bf16 %v3440_v51, %v1042_v19  ;;  %v1057_v47 = vmax.bf16 %v3440_v51, %v1041_v22  ;;  %v1471_v22 = vunpack.c.l.s4 %v2489_v1 }
 0x172   :  { %v1001_v28 = vpop.f32.mrf.mxu0 }
 0x174   :  { %v2356_v30 = vpop.f32.mrf.mxu0 }
 0x175   :  { %v1045_v11 = vpack.c.bf16 %v2356_v30, %v2355_v26  ;;  %v1978_v26 = vld [vmem:[#allocation2] sm:$0x1] }
 0x176   :  { %v1004_v31 = vpop.f32.mrf.mxu0  ;;  %1981 = vperm.xlu0 %2399, %v1978_v26   ;;  %v2434_v30 = vld [vmem:[%s3435_s2 + $0x80] ss:$8 sps:$4 sm:$0xff]  }
 0x177   :  { %v1061_v63 = vmax.bf16 %v3440_v51, %v1045_v11  ;;  %v1044_v4 = vpack.c.bf16 %v1004_v31, %v1001_v28  ;;  %v2428_v28 = vld [vmem:[%s3435_s2 + $0x70] ss:$8 sps:$4 sm:$0xff]   ;;  %v2435_v31 = vld [vmem:[%s3435_s2 + $0x94] ss:$8 sps:$4 sm:$0xff]   ;;  %v1998_v11 = vunpack.c.l.s4 %v2488_v60 }
 0x178   :  { %v2359_v32 = vpop.f32.mrf.mxu0 }
 0x179   :  { %v1060_v13 = vmax.bf16 %v3440_v51, %v1044_v4  ;;  %v1999_v2 = vunpack.c.0.s8 %v1998_v11 }
 0x17a   :  { %v1017_v46 = vpop.f32.mrf.mxu0 }
 0x17c   :  { %v2360_v25 = vpop.f32.mrf.mxu0 }
 0x17d   :  { %v1047_v45 = vpack.c.bf16 %v2360_v25, %v2359_v32  ;;  %v2439_v32 = vld [vmem:[%s3435_s2 + $0x90] ss:$8 sps:$4 sm:$0xff]  }
 0x17e   :  { %v1020_v53 = vpop.f32.mrf.mxu0  ;;  %v2458_v25 = vld [vmem:[%s3435_s2 + $0xd0] ss:$8 sps:$4 sm:$0xff]  }
 0x17f   :  { %v1063_v3 = vmax.bf16 %v3440_v51, %v1047_v45  ;;  %v1046_v42 = vpack.c.bf16 %v1020_v53, %v1017_v46  ;;  %v2447_v46 = vld [vmem:[%s3435_s2 + $0xb4] ss:$8 sps:$4 sm:$0xff]   ;;  %v2459_v45 = vld [vmem:[%s3435_s2 + $0xe4] ss:$8 sps:$4 sm:$0xff]   ;;  %v2461_v53 = vld [vmem:[%s3435_s2 + $0xe0] ss:$8 sps:$4 sm:$0xff]  }
 0x181   :  { %v1062_v41 = vmax.bf16 %v3440_v51, %v1046_v42  ;;  %2189 = vmatprep.subr.bf16.mxu0 %v1063_v3  ;;  %2361 = vmatprep.subr.bf16.mxu1 %v1063_v3  ;;  %v2462_v3 = vld [vmem:[%s3435_s2 + $0xf4] ss:$8 sps:$4 sm:$0xff]   ;;  %v2464_v42 = vld [vmem:[%s3435_s2 + $0xf0] ss:$8 sps:$4 sm:$0xff]  }
 0x182   :  { %2190 = vmatpush3.bf16.msra.mxu0 %v1055_v52  ;;  %2369 = vmatpush3.bf16.msra.mxu1 %v1055_v52  ;;  %v1473_v52 = vlaneseq }
 0x183   :  { %2191 = vmatprep.subr.bf16.mxu0 %v1062_v41  ;;  %2362 = vmatprep.subr.bf16.mxu1 %v1062_v41 }
 0x184   :  { %v3159_v41 = vshrl.u32 %v1473_v52, 7 }
 0x186   :  { %2192 = vmatpush3.bf16.msra.mxu0 %v1054_v9  ;;  %2370 = vmatpush3.bf16.msra.mxu1 %v1054_v9  ;;  %3457 = vst [vmem:[#allocation3_spill] sm:$0xff] %v3159_v41  ;;  %v3169_v4 = vsub.s32 %v1999_v2, %v3159_v41 }
 0x187   :  { %2193 = vmatprep.subr.bf16.mxu0 %v1061_v63  ;;  %2363 = vmatprep.subr.bf16.mxu1 %v1061_v63  ;;  %v1996_v63 = vcombine.high %v3164_v7, %v3164_v7 }
 0x188   :  { %3459 = vst [vmem:[#allocation5_spill] sm:$0xff] %v3169_v4 }
 0x189   :  { %v2010_v38 = vrot.slane %v1996_v63, %v3169_v4 }
 0x18a   :  { %2194 = vmatpush3.bf16.msra.mxu0 %v1053_v49  ;;  %2371 = vmatpush3.bf16.msra.mxu1 %v1053_v49 }
 0x18b   :  { %2195 = vmatprep.subr.bf16.mxu0 %v1060_v13  ;;  %2364 = vmatprep.subr.bf16.mxu1 %v1060_v13 }
 0x18e   :  { %2196 = vmatpush3.bf16.msra.mxu0 %v1052_v10  ;;  %2372 = vmatpush3.bf16.msra.mxu1 %v1052_v10 }
 0x18f   :  { %2197 = vmatprep.subr.bf16.mxu0 %v1059_v61  ;;  %2365 = vmatprep.subr.bf16.mxu1 %v1059_v61 }
 0x192   :  { %2198 = vmatpush3.bf16.msra.mxu0 %v1051_v24  ;;  %2373 = vmatpush3.bf16.msra.mxu1 %v1051_v24 }
 0x193   :  { %2199 = vmatprep.subr.bf16.mxu0 %v1058_v37  ;;  %2366 = vmatprep.subr.bf16.mxu1 %v1058_v37 }
 0x196   :  { %2200 = vmatpush3.bf16.msra.mxu0 %v1050_v27  ;;  %2374 = vmatpush3.bf16.msra.mxu1 %v1050_v27 }
 0x197   :  { %2201 = vmatprep.subr.bf16.mxu0 %v1057_v47  ;;  %2367 = vmatprep.subr.bf16.mxu1 %v1057_v47 }
 0x19a   :  { %2202 = vmatpush3.bf16.msra.mxu0 %v1049_v44  ;;  %2375 = vmatpush3.bf16.msra.mxu1 %v1049_v44 }
 0x19b   :  { %2203 = vmatprep.subr.bf16.mxu0 %v1056_v15  ;;  %2368 = vmatprep.subr.bf16.mxu1 %v1056_v15 }
 0x19e   :  { %2204 = vmatpush3.bf16.msra.mxu0 %v1048_v59  ;;  %2376 = vmatpush3.bf16.msra.mxu1 %v1048_v59 }
 0x1a1   :  { %1321 = vmatmul.mubr.bf16.vlgmr.msra.gmra.mxu1 %v2417_v57  ;;  %1289 = vmatmul.mubr.bf16.vlgmr.msra.gmra.mxu0 %v2431_v54  ;;  %v3194_v54 = vpop.permute.xlu1 %1635 }
 0x1a2   :  { %1328 = vmatprep.mubr.bf16.mxu1 %v2420_v34  ;;  %1296 = vmatprep.mubr.bf16.mxu0 %v2437_v55  ;;  %v3196_v55 = vpop.permute.xlu0 %1827 }
 0x1a9   :  { %1329 = vmatmul.mubr.bf16.gmra.mxu1 %v2422_v18  ;;  %1297 = vmatmul.mubr.bf16.gmra.mxu0 %v2440_v40 }
 0x1aa   :  { %1336 = vmatprep.mubr.bf16.mxu1 %v2423_v56  ;;  %1304 = vmatprep.mubr.bf16.mxu0 %v2443_v58 }
 0x1b1   :  { %1337 = vmatmul.mubr.bf16.gmra.mxu1 %v2425_v8  ;;  %1305 = vmatmul.mubr.bf16.gmra.mxu0 %v2446_v5  ;;  %v3202_v8 = vpop.permute.xlu1 %1647 }
 0x1b2   :  { %1344 = vmatprep.mubr.bf16.mxu1 %v2426_v17  ;;  %1312 = vmatprep.mubr.bf16.mxu0 %v2449_v14  ;;  %v3206_v14 = vpop.permute.xlu0 %1839 }
 0x1b9   :  { %1345 = vmatmul.mubr.bf16.gmra.mxu1 %v2428_v28  ;;  %1313 = vmatmul.mubr.bf16.gmra.mxu0 %v2452_v0 }
 0x1ba   :  { %1352 = vmatprep.mubr.bf16.mxu1 %v2429_v29  ;;  %2045 = vmatprep.mubr.bf16.mxu0 %v2010_v38 }
 0x1c1   :  { %1353 = vmatmul.mubr.bf16.gmra.mxu1 %v2434_v30  ;;  %v3210_v30 = vpop.permute.xlu1 %1815 }
 0x1c2   :  { %1360 = vmatprep.mubr.bf16.mxu1 %v2435_v31 }
 0x1c9   :  { %1361 = vmatmul.mubr.bf16.gmra.mxu1 %v2439_v32 }
 0x1ca   :  { %1368 = vmatprep.mubr.bf16.mxu1 %v2441_v33  ;;  %v3214_v33 = vpop.permute.xlu0 %1803 }
 0x1d1   :  { %1369 = vmatmul.mubr.bf16.gmra.mxu1 %v2445_v39 }
 0x1d2   :  { %1376 = vmatprep.mubr.bf16.mxu1 %v2447_v46 }
 0x1d9   :  { %1377 = vmatmul.mubr.bf16.gmra.mxu1 %v2451_v50 }
 0x1da   :  { %1384 = vmatprep.mubr.bf16.mxu1 %v2453_v48 }
 0x1e1   :  { %1385 = vmatmul.mubr.bf16.gmra.mxu1 %v2455_v36  ;;  %v3220_v36 = vpop.permute.xlu1 %1623 }
 0x1e2   :  { %1392 = vmatprep.mubr.bf16.mxu1 %v2456_v43 }
 0x1e5   :  { %v3236_v11 = vpop.permute.xlu1 %1791 }
 0x1e9   :  { %1393 = vmatmul.mubr.bf16.gmra.mxu1 %v2458_v25  ;;  %v3248_v38 = vpop.permute.xlu1 %1599 }
 0x1ea   :  { %1400 = vmatprep.mubr.bf16.mxu1 %v2459_v45 }
 0x1f1   :  { %1401 = vmatmul.mubr.bf16.gmra.mxu1 %v2461_v53  ;;  %v3226_v53 = vpop.permute.xlu0 %1611 }
 0x1f2   :  { %1408 = vmatprep.mubr.bf16.mxu1 %v2462_v3 }
 0x1f5   :  { %v3240_v2 = vpop.permute.xlu0 %1779 }
 0x1f9   :  { %1409 = vmatmul.mubr.bf16.gmra.mxu1 %v2464_v42 }
 0x261   :  { %v2229_v62 = vpop.f32.mrf.mxu1  ;;  %v3216_v46 = vpop.f32.mrf.mxu0 }
 0x262   :  { %3464 = vst [vmem:[#allocation10_spill] sm:$0xff] %v3216_v46 }
 0x263   :  { %v2230_v9 = vpop.f32.mrf.mxu1  ;;  %v3222_v25 = vpop.f32.mrf.mxu0 }
 0x264   :  { %v3171_v6 = vadd.f32 %v2230_v9, %v2229_v62  ;;  %3466 = vst [vmem:[#allocation12_spill] sm:$0xff] %v3222_v25 }
 0x265   :  { %v2232_v23 = vpop.f32.mrf.mxu1  ;;  %v3234_v60 = vpop.f32.mrf.mxu0 }
 0x266   :  { %3460 = vst [vmem:[#allocation6_spill] sm:$0xff] %v3171_v6  ;;  %3470 = vst [vmem:[#allocation16_spill] sm:$0xff] %v3234_v60 }
 0x267   :  { %v2233_v12 = vpop.f32.mrf.mxu1  ;;  %v3244_v63 = vpop.f32.mrf.mxu0 }
 0x268   :  { %v3176_v13 = vadd.f32 %v2233_v12, %v2232_v23  ;;  %3472 = vst [vmem:[#allocation18_spill] sm:$0xff] %v3244_v63 }
 0x269   :  { %v2235_v35 = vpop.f32.mrf.mxu1 }
 0x26a   :  { %3461 = vst [vmem:[#allocation7_spill] sm:$0xff] %v3176_v13 }
 0x26b   :  { %v2236_v10 = vpop.f32.mrf.mxu1 }
 0x26c   :  { %v3180_v61 = vadd.f32 %v2236_v10, %v2235_v35  ;;  %v3252_v35 = vpop.f32.mrf.mxu0  ;;  %v3254_v10 = vpop.permute.xlu0 %1587 }
 0x26d   :  { %v2238_v19 = vpop.f32.mrf.mxu1  ;;  %3473 = vst [vmem:[#allocation19_spill] sm:$0xff] %v3252_v35 }
 0x26f   :  { %v2239_v20 = vpop.f32.mrf.mxu1 }
 0x270   :  { %v3182_v21 = vadd.f32 %v2239_v20, %v2238_v19 }
 0x271   :  { %v2241_v24 = vpop.f32.mrf.mxu1 }
 0x273   :  { %v2242_v37 = vpop.f32.mrf.mxu1 }
 0x274   :  { %v3186_v26 = vadd.f32 %v2242_v37, %v2241_v24  ;;  %v3260_v24 = vpop.f32.mrf.mxu0  ;;  %v3262_v37 = vpop.permute.xlu1 %1767 }
 0x275   :  { %v2244_v27 = vpop.f32.mrf.mxu1  ;;  %3474 = vst [vmem:[#allocation20_spill] sm:$0xff] %v3260_v24 }
 0x277   :  { %v2245_v47 = vpop.f32.mrf.mxu1 }
 0x278   :  { %v3188_v16 = vadd.f32 %v2245_v47, %v2244_v27  ;;  %v3266_v47 = vpop.permute.xlu0 %1755 }
 0x279   :  { %v2247_v44 = vpop.f32.mrf.mxu1 }
 0x27b   :  { %v2248_v59 = vpop.f32.mrf.mxu1 }
 0x27c   :  { %v3192_v57 = vadd.f32 %v2248_v59, %v2247_v44  ;;  %v3270_v59 = vpop.f32.mrf.mxu0 }
 0x27d   :  { %v2250_v34 = vpop.f32.mrf.mxu1  ;;  %3475 = vst [vmem:[#allocation21_spill] sm:$0xff] %v3270_v59 }
 0x27f   :  { %v2251_v18 = vpop.f32.mrf.mxu1 }
 0x280   :  { %v3198_v40 = vadd.f32 %v2251_v18, %v2250_v34  ;;  %v3274_v18 = vpop.permute.xlu1 %1575 }
 0x281   :  { %v2253_v56 = vpop.f32.mrf.mxu1 }
 0x283   :  { %v2254_v5 = vpop.f32.mrf.mxu1 }
 0x284   :  { %v3204_v17 = vadd.f32 %v2254_v5, %v2253_v56  ;;  %v3276_v5 = vpop.f32.mrf.mxu0 }
 0x285   :  { %v2256_v28 = vpop.f32.mrf.mxu1  ;;  %3476 = vst [vmem:[#allocation22_spill] sm:$0xff] %v3276_v5 }
 0x286   :  { %3462 = vst [vmem:[#allocation8_spill] sm:$0xff] %v3204_v17  ;;  %v1472_v17 = vunpack.c.0.s8 %v1471_v22 }
 0x287   :  { %v2257_v0 = vpop.f32.mrf.mxu1 }
 0x288   :  { %v3208_v29 = vadd.f32 %v2257_v0, %v2256_v28  ;;  %v3278_v28 = vpop.permute.xlu0 %1563  ;;  %v3299_v60 = vsub.s32 %v1472_v17, %v3159_v41 }
 0x289   :  { %v2259_v31 = vpop.f32.mrf.mxu1 }
 0x28a   :  { %3463 = vst [vmem:[#allocation9_spill] sm:$0xff] %v3208_v29  ;;  %v1644_v46 = vrot.slane %v3194_v54, %v3299_v60  ;;  %v1656_v5 = vrot.slane %v3202_v8, %v3299_v60  ;;  %v1836_v35 = vrot.slane %v3196_v55, %v3299_v60  ;;  %v1848_v17 = vrot.slane %v3206_v14, %v3299_v60 }
 0x28b   :  { %v2260_v39 = vpop.f32.mrf.mxu1  ;;  %v1812_v41 = vrot.slane %v3214_v33, %v3299_v60  ;;  %v1824_v54 = vrot.slane %v3210_v30, %v3299_v60  ;;  %v1632_v8 = vrot.slane %v3220_v36, %v3299_v60  ;;  %v1800_v14 = vrot.slane %v3236_v11, %v3299_v60 }
 0x28c   :  { %v3218_v50 = vadd.f32 %v2260_v39, %v2259_v31  ;;  %v3280_v31 = vpop.permute.xlu1 %1743  ;;  %v2159_v55 = vcombine.low %v1644_v46, %v1656_v5  ;;  %v1788_v33 = vrot.slane %v3240_v2, %v3299_v60  ;;  %v2167_v36 = vcombine.low %v1836_v35, %v1848_v17 }
 0x28d   :  { %v2262_v48 = vpop.f32.mrf.mxu1  ;;  %v1608_v46 = vrot.slane %v3248_v38, %v3299_v60  ;;  %v1596_v11 = vrot.slane %v3254_v10, %v3299_v60  ;;  %v1584_v38 = vrot.slane %v3274_v18, %v3299_v60  ;;  %v1572_v10 = vrot.slane %v3278_v28, %v3299_v60 }
 0x28e   :  { %3465 = vst [vmem:[#allocation11_spill] sm:$0xff] %v3218_v50  ;;  %v3485_v17 = vpack.c.bf16 %v3182_v21, %v3180_v61  ;;  %v3488_v21 = vld [vmem:[#allocation7_spill] sm:$0xff] }
 0x28f   :  { %v2263_v43 = vpop.f32.mrf.mxu1 }
 0x290   :  { %v3224_v45 = vadd.f32 %v2263_v43, %v2262_v48  ;;  %v3282_v48 = vpop.f32.mrf.mxu0  ;;  %v3284_v43 = vpop.permute.xlu0 %1731 }
 0x291   :  { %v3228_v3 = vpop.f32.mrf.mxu1  ;;  %3477 = vst [vmem:[#allocation23_spill] sm:$0xff] %v3282_v48  ;;  %v3288_v15 = vpop.permute.xlu1 %1551 }
 0x292   :  { %3467 = vst [vmem:[#allocation13_spill] sm:$0xff] %v3224_v45  ;;  %3468 = vst [vmem:[#allocation14_spill] sm:$0xff] %v3228_v3  ;;  %v3286_v42 = vpop.f32.mrf.mxu0 }
 0x293   :  { %v3232_v52 = vpop.f32.mrf.mxu1  ;;  %3478 = vst [vmem:[#allocation24_spill] sm:$0xff] %v3286_v42 }
 0x294   :  { %3469 = vst [vmem:[#allocation15_spill] sm:$0xff] %v3232_v52  ;;  %v3290_v58 = vpop.permute.xlu0 %1539  ;;  %v3292_v7 = vpop.f32.mrf.mxu0 }
 0x295   :  { %v3238_v62 = vpop.f32.mrf.mxu1  ;;  %3479 = vst [vmem:[#allocation25_spill] sm:$0xff] %v3292_v7  ;;  %v3294_v50 = vpop.permute.xlu1 %1719 }
 0x296   :  { %v3296_v63 = vpop.f32.mrf.mxu0 }
 0x297   :  { %v3242_v9 = vpop.f32.mrf.mxu1  ;;  %3480 = vst [vmem:[#allocation26_spill] sm:$0xff] %v3296_v63 }
 0x298   :  { %3471 = vst [vmem:[#allocation17_spill] sm:$0xff] %v3242_v9  ;;  %v3301_v25 = vpop.permute.xlu0 %1707  ;;  %v3307_v22 = vpop.f32.mrf.mxu0 }
 0x299   :  { %v3246_v23 = vpop.f32.mrf.mxu1  ;;  %v3315_v63 = vpop.permute.xlu1 %1527 }
 0x29a   :  { %3481 = vst [vmem:[#allocation27_spill] sm:$0xff] %v3315_v63  ;;  %v2224_v52 = vpop.f32.mrf.mxu0  ;;  %v2166_v63 = vcombine.low %v1812_v41, %v1824_v54 }
 0x29b   :  { %v3250_v12 = vpop.f32.mrf.mxu1 }
 0x29c   :  { %v3327_v42 = vpop.permute.xlu0 %1515 }
 0x29d   :  { %v3256_v19 = vpop.f32.mrf.mxu1  ;;  %v3333_v2 = vpop.permute.xlu1 %1695  ;;  %v1524_v61 = vrot.slane %v3327_v42, %v3299_v60 }
 0x29f   :  { %v3258_v20 = vpop.f32.mrf.mxu1 }
 0x2a0   :  { %v2276_v28 = vadd.f32 %v3258_v20, %v3256_v19  ;;  %v1728_v19 = vrot.slane %v3294_v50, %v3299_v60  ;;  %v1716_v20 = vrot.slane %v3301_v25, %v3299_v60 }
 0x2a1   :  { %v3264_v27 = vpop.f32.mrf.mxu1 }
 0x2a3   :  { %v3268_v44 = vpop.f32.mrf.mxu1 }
 0x2a5   :  { %v3272_v34 = vpop.f32.mrf.mxu1 }
 0x2a7   :  { %v2281_v56 = vpop.f32.mrf.mxu1 }
 0x2a9   :  { %v2283_v0 = vpop.f32.mrf.mxu1 }
 0x2ab   :  { %v2284_v39 = vpop.f32.mrf.mxu1 }
 0x2ad   :  { %v2286_v49 = vpop.f32.mrf.mxu1 }
 0x2af   :  { %v2287_v32 = vpop.f32.mrf.mxu1 }
 0x2b0   :  { %v2288_v3 = vadd.f32 %v2287_v32, %v2286_v49  ;;  %v3482_v49 = vpack.c.bf16 %v3198_v40, %v3192_v57  ;;  %v1684_v57 = vpop.permute.xlu0 %1683  ;;  %v1752_v40 = vrot.slane %v3280_v31, %v3299_v60 }
 0x2b1   :  { %v2289_v51 = vpop.f32.mrf.mxu1 }
 0x2b2   :  { %v1952_v32 = vadd.bf16 %v2159_v55, %v3482_v49  ;;  %v3493_v49 = vld [vmem:[#allocation23_spill] sm:$0xff] }
 0x2b3   :  { %v2290_v4 = vpop.f32.mrf.mxu1 }
 0x2b5   :  { %v2292_v29 = vpop.f32.mrf.mxu1 }
 0x2b7   :  { %v2293_v45 = vpop.f32.mrf.mxu1 }
 0x2b8   :  { %v2294_v24 = vadd.f32 %v2293_v45, %v2292_v29  ;;  %v1620_v29 = vrot.slane %v3226_v53, %v3299_v60  ;;  %v2291_v45 = vadd.f32 %v2290_v4, %v2289_v51  ;;  %v2285_v53 = vadd.f32 %v2284_v39, %v2283_v0 }
 0x2b9   :  { %v2295_v1 = vpop.f32.mrf.mxu1  ;;  %v2165_v4 = vcombine.low %v1788_v33, %v1800_v14 }
 0x2ba   :  { %v1431_v30 = vpack.c.bf16 %v2294_v24, %v2291_v45  ;;  %v2158_v9 = vcombine.low %v1620_v29, %v1632_v8  ;;  %v2226_v24 = vpop.f32.mrf.mxu0  ;;  %v1430_v41 = vpack.c.bf16 %v2288_v3, %v2285_v53  ;;  %v1740_v3 = vrot.slane %v3284_v43, %v3299_v60  ;;  %v3486_v45 = vld [vmem:[#allocation17_spill] sm:$0xff]  ;;  %v3491_v53 = vld [vmem:[#allocation14_spill] sm:$0xff] }
 0x2bb   :  { %v2296_v59 = vpop.f32.mrf.mxu1  ;;  %v2225_v8 = vadd.f32 %v2224_v52, %v3307_v22  ;;  %v2270_v50 = vadd.f32 %v3486_v45, %v3238_v62  ;;  %v1704_v22 = vrot.slane %v3333_v2, %v3299_v60  ;;  %v1692_v62 = vrot.slane %v1684_v57, %v3299_v60 }
 0x2bc   :  { %v2297_v6 = vadd.f32 %v2296_v59, %v2295_v1  ;;  %v1959_v35 = vadd.bf16 %v2166_v63, %v1431_v30  ;;  %v2279_v63 = vadd.f32 %v3268_v44, %v3264_v27  ;;  %v2227_v0 = vpop.f32.mrf.mxu0  ;;  %v1958_v39 = vadd.bf16 %v2165_v4, %v1430_v41  ;;  %v3489_v30 = vld [vmem:[#allocation6_spill] sm:$0xff] }
 0x2bd   :  { %v2298_v7 = vpop.f32.mrf.mxu1  ;;  %v2156_v27 = vcombine.low %v1572_v10, %v1584_v38  ;;  %v1560_v44 = vrot.slane %v3288_v15, %v3299_v60  ;;  %v2273_v1 = vadd.f32 %v3250_v12, %v3246_v23  ;;  %v2228_v29 = vadd.f32 %v2227_v0, %v2226_v24  ;;  %v3487_v23 = vld [vmem:[#allocation27_spill] sm:$0xff]  ;;  %v3495_v24 = vld [vmem:[#allocation25_spill] sm:$0xff] }
 0x2be   :  { %v1536_v12 = vrot.slane %v3487_v23, %v3299_v60  ;;  %v2161_v57 = vcombine.low %v1692_v62, %v1704_v22 }
 0x2bf   :  { %v2299_v48 = vpop.f32.mrf.mxu1  ;;  %v1428_v55 = vpack.c.bf16 %v2276_v28, %v2273_v1 }
 0x2c0   :  { %v2300_v13 = vadd.f32 %v2299_v48, %v2298_v7  ;;  %v2282_v7 = vadd.f32 %v2281_v56, %v3272_v34  ;;  %v2157_v56 = vcombine.low %v1596_v11, %v1608_v46  ;;  %v2154_v38 = vcombine.low %v1524_v61, %v1536_v12 }
 0x2c2   :  { %v1432_v51 = vpack.c.bf16 %v2300_v13, %v2297_v6  ;;  %v1776_v6 = vrot.slane %v3262_v37, %v3299_v60  ;;  %v1764_v13 = vrot.slane %v3266_v47, %v3299_v60  ;;  %v3483_v37 = vmov 0  }
 0x2c3   :  { %v3484_v47 = vpack.c.bf16 %v3188_v16, %v3186_v26  ;;  %v1968_v5 = vmax.bf16 %v3483_v37, %v1952_v32  ;;  %v1429_v31 = vpack.c.bf16 %v2282_v7, %v2279_v63  ;;  %v1975_v48 = vmax.bf16 %v3483_v37, %v1959_v35  ;;  %v1504_v16 = vpop.permute.xlu1 %1503  ;;  %v3494_v32 = vld [vmem:[#allocation24_spill] sm:$0xff]  ;;  %v3496_v7 = vld [vmem:[#allocation26_spill] sm:$0xff]  ;;  %v3497_v63 = vld [vmem:[#allocation19_spill] sm:$0xff] }
 0x2c4   :  { %v1960_v59 = vadd.bf16 %v2167_v36, %v1432_v51  ;;  %v2164_v43 = vcombine.low %v1764_v13, %v1776_v6  ;;  %v1548_v26 = vrot.slane %v3290_v58, %v3299_v60  ;;  %v1950_v15 = vadd.bf16 %v2157_v56, %v3485_v17  ;;  %v1492_v58 = vpop.permute.xlu0 %1491  ;;  %v3492_v51 = vld [vmem:[#allocation15_spill] sm:$0xff] }
 0x2c5   :  { %v1951_v18 = vadd.bf16 %v2158_v9, %v3484_v47  ;;  %v2163_v9 = vcombine.low %v1740_v3, %v1752_v40  ;;  %v1974_v25 = vmax.bf16 %v3483_v37, %v1958_v39  ;;  %v3490_v36 = vpack.c.bf16 %v3488_v21, %v3489_v30  ;;  %v3508_v30 = vld [vmem:[#allocation9_spill] sm:$0xff] }
 0x2c6   :  { %v1976_v34 = vmax.bf16 %v3483_v37, %v1960_v59  ;;  %v1957_v14 = vadd.bf16 %v2164_v43, %v1429_v31  ;;  %v2155_v33 = vcombine.low %v1548_v26, %v1560_v44  ;;  %v2267_v4 = vadd.f32 %v3492_v51, %v3491_v53 }
 0x2c7   :  { %v1967_v54 = vmax.bf16 %v3483_v37, %v1951_v18  ;;  %v1949_v52 = vadd.bf16 %v2156_v27, %v3490_v36  ;;  %v1966_v46 = vmax.bf16 %v3483_v37, %v1950_v15  ;;  %v1672_v11 = vpop.permute.xlu1 %1671  ;;  %v2219_v42 = vadd.f32 %v3494_v32, %v3493_v49  ;;  %v3499_v18 = vld [vmem:[#allocation21_spill] sm:$0xff]  ;;  %v3503_v15 = vld [vmem:[#allocation16_spill] sm:$0xff] }
 0x2c8   :  { %2301 = vmatprep.subr.bf16.mxu0 %v1976_v34  ;;  %v2222_v41 = vadd.f32 %v3496_v7, %v3495_v24  ;;  %v1420_v35 = vpack.c.bf16 %v2228_v29, %v2225_v8  ;;  %v2162_v59 = vcombine.low %v1716_v20, %v1728_v19  ;;  %v1427_v6 = vpack.c.bf16 %v2270_v50, %v2267_v4  ;;  %v1660_v10 = vpop.permute.xlu0 %1659  ;;  %v3498_v34 = vld [vmem:[#allocation20_spill] sm:$0xff]  ;;  %v3512_v49 = vld [vmem:[#allocation5_spill] sm:$0xff] }
 0x2c9   :  { %2302 = vmatpush3.bf16.msra.mxu0 %v1968_v5  ;;  %v1956_v13 = vadd.bf16 %v2163_v9, %v1428_v55  ;;  %v1973_v2 = vmax.bf16 %v3483_v37, %v1957_v14  ;;  %v1512_v40 = vrot.slane %v1504_v16, %v3299_v60  ;;  %v1500_v3 = vrot.slane %v1492_v58, %v3299_v60  ;;  %v3500_v5 = vld [vmem:[#allocation22_spill] sm:$0xff]  ;;  %v3502_v19 = vld [vmem:[#allocation12_spill] sm:$0xff]  ;;  %v3505_v55 = vld [vmem:[#allocation13_spill] sm:$0xff] }
 0x2ca   :  { %2303 = vmatprep.subr.bf16.mxu0 %v1975_v48  ;;  %v2213_v56 = vadd.f32 %v3498_v34, %v3497_v63  ;;  %v1965_v47 = vmax.bf16 %v3483_v37, %v1949_v52  ;;  %v2216_v28 = vadd.f32 %v3500_v5, %v3499_v18  ;;  %v1419_v0 = vpack.c.bf16 %v2222_v41, %v2219_v42  ;;  %v3501_v9 = vld [vmem:[#allocation10_spill] sm:$0xff]  ;;  %v3506_v14 = vld [vmem:[#allocation11_spill] sm:$0xff]  ;;  %v3509_v36 = vld [vmem:[#allocation8_spill] sm:$0xff] }
 0x2cb   :  { %v1480_v31 = vpop.permute.xlu1 %1479  ;;  %v1948_v39 = vadd.bf16 %v2155_v33, %v1420_v35  ;;  %v1680_v48 = vrot.slane %v1672_v11, %v3299_v60  ;;  %v1668_v43 = vrot.slane %v1660_v10, %v3299_v60  ;;  %v1955_v27 = vadd.bf16 %v2162_v59, %v1427_v6  ;;  %v3511_v11 = vld [vmem:[#allocation4_spill] sm:$0xff]  ;;  %v3514_v42 = vld [vmem:[#allocation3_spill] sm:$0xff] }
 0x2cc   :  { %v1972_v44 = vmax.bf16 %v3483_v37, %v1956_v13  ;;  %v1468_v26 = vpop.permute.xlu0 %1467  ;;  %v2153_v16 = vcombine.low %v1500_v3, %v1512_v40  ;;  %v2207_v20 = vadd.f32 %v3502_v19, %v3501_v9  ;;  %v1488_v17 = vrot.slane %v1480_v31, %v3299_v60 }
 0x2cd   :  { %2304 = vmatpush3.bf16.msra.mxu0 %v1967_v54  ;;  %v1476_v1 = vrot.slane %v1468_v26, %v3299_v60  ;;  %v3504_v54 = vld [vmem:[#allocation18_spill] sm:$0xff]  ;;  %v1418_v8 = vpack.c.bf16 %v2216_v28, %v2213_v56  ;;  %v1947_v29 = vadd.bf16 %v2154_v38, %v1419_v0  ;;  %v1964_v45 = vmax.bf16 %v3483_v37, %v1948_v39 }
 0x2ce   :  { %2305 = vmatprep.subr.bf16.mxu0 %v1974_v25  ;;  %v2210_v58 = vadd.f32 %v3504_v54, %v3503_v15  ;;  %v2160_v50 = vcombine.low %v1668_v43, %v1680_v48  ;;  %v3507_v25 = vpack.c.bf16 %v3505_v55, %v3506_v14  ;;  %v1971_v23 = vmax.bf16 %v3483_v37, %v1955_v27 }
 0x2cf   :  { %v1946_v61 = vadd.bf16 %v2153_v16, %v1418_v8  ;;  %v1963_v60 = vmax.bf16 %v3483_v37, %v1947_v29  ;;  %v2152_v21 = vcombine.low %v1476_v1, %v1488_v17  ;;  %v3510_v52 = vpack.c.bf16 %v3508_v30, %v3509_v36 }
 0x2d0   :  { %v1954_v33 = vadd.bf16 %v2161_v57, %v3507_v25  ;;  %v1417_v12 = vpack.c.bf16 %v2210_v58, %v2207_v20  ;;  %v3513_v32 = vrot.slane %v3511_v11, %v3512_v49  ;;  %v1986_v24 = vsub.s32 0, %v3514_v42  ;;  %v1982_v7 = vpop.permute.xlu0 %1981 }
 0x2d1   :  { %2306 = vmatpush3.bf16.msra.mxu0 %v1966_v46  ;;  %v1953_v22 = vadd.bf16 %v2160_v50, %v3510_v52  ;;  %v1962_v53 = vmax.bf16 %v3483_v37, %v1946_v61 }
 0x2d2   :  { %2307 = vmatprep.subr.bf16.mxu0 %v1973_v2  ;;  %v1970_v62 = vmax.bf16 %v3483_v37, %v1954_v33  ;;  %v1945_v51 = vadd.bf16 %v2152_v21, %v1417_v12  ;;  %v1987_v59 = vrot.slane %v1982_v7, %v1986_v24 }
 0x2d3   :  { %v1969_v4 = vmax.bf16 %v3483_v37, %v1953_v22 }
 0x2d4   :  { %v1961_v46 = vmax.bf16 %v3483_v37, %v1945_v51 }
 0x2d5   :  { %2308 = vmatpush3.bf16.msra.mxu0 %v1965_v47 }
 0x2d6   :  { %2309 = vmatprep.subr.bf16.mxu0 %v1972_v44 }
 0x2d9   :  { %2310 = vmatpush3.bf16.msra.mxu0 %v1964_v45 }
 0x2da   :  { %2311 = vmatprep.subr.bf16.mxu0 %v1971_v23 }
 0x2dd   :  { %2312 = vmatpush3.bf16.msra.mxu0 %v1963_v60 }
 0x2de   :  { %2313 = vmatprep.subr.bf16.mxu0 %v1970_v62 }
 0x2e1   :  { %2314 = vmatpush3.bf16.msra.mxu0 %v1962_v53 }
 0x2e2   :  { %2315 = vmatprep.subr.bf16.mxu0 %v1969_v4 }
 0x2e5   :  { %2316 = vmatpush3.bf16.msra.mxu0 %v1961_v46 }
 0x2e8   :  { %2046 = vmatmul.mubr.bf16.vlgmr.msra.gmra.mxu0 %v3513_v32 }
 0x3a8   :  { %v2317_v41 = vpop.f32.mrf.mxu0 }
 0x3aa   :  { %v2318_v35 = vpop.f32.mrf.mxu0 }
 0x3ab   :  { %v2319_v6 = vadd.f32 %v2318_v35, %v2317_v41 }
 0x3ac   :  { %v2320_v13 = vpop.f32.mrf.mxu0 }
 0x3ad   :  { %v2048_v2 = vadd.f32 %v2319_v6, %v1987_v59 }
 0x3ae   :  { %v2321_v38 = vpop.f32.mrf.mxu0 }
 0x3af   :  { %v2169_v10 = vmul.f32 -1.442695, %v2048_v2 }
 0x3b1   :  { %2477 = vpow2.f32 %v2169_v10 }
 0x3be   :  { %v2478_v57 = vpop.eup %2477 }
 0x3bf   :  { %v2056_v40 = vadd.f32 1.0, %v2478_v57 }
 0x3c1   :  { %2479 = vrcp.f32 %v2056_v40 }
 0x3ce   :  { %v2480_v37 = vpop.eup %2479 }
 0x3cf   :  { %2059 = vst [vmem:[%s3439_s6] sm:$0x1] %v2480_v37 }

</bundles_post_ra>
